<compile_context>
chip_gen: v6e
topology: v6e:2x2x1
jax: 0.10.0
libtpu: 0.0.40
codegen_flags: <defaults>
</compile_context>

<pallas_src>
import functools

import jax
import jax.numpy as jnp
from jax import lax
from jax.experimental import pallas as pl
from jax.experimental.pallas import tpu as pltpu

EPS = 1e-9
_LANES = 128

# First (single_buffer, onehot_dtype) configuration that lowered successfully;
# cached so later calls skip the fallback probing.
_WORKING_CONFIG = []


def _round_up(x, m):
    return ((x + m - 1) // m) * m


def _uhg_loss_kernel(onehot_dtype, bs_ref, zT_ref, edge_ref, neg_ref, out_ref,
                     pos_acc, neg_acc, cnt_acc):
    """One (chunk, edge-tile) grid cell of the UHG loss.

    Per-chunk output block (1, 3, 128) f32 of lane-partial sums:
      row 0: sum over masked positive edges of clamp(quadrance, max=10)
      row 1: sum over negative edges of relu(1 - clamp(quadrance, max=10))
      row 2: number of masked (valid) positive edges
    """
    D, N = zT_ref.shape
    TE = edge_ref.shape[1]
    BN = neg_ref.shape[1]
    chunk = pl.program_id(0)
    step = pl.program_id(1)
    batch_size = bs_ref[0]

    def quad_clamped(idx0, idx1):
        """clamp(uhg_quadrance(z[idx0], z[idx1]), max=10); edges on lanes."""
        width = idx0.shape[1]
        # Fused in-kernel gather: ONE (D, N) @ (N, 2*width) one-hot matmul on
        # the MXU yields both endpoints at once (halves MXU pushes / drains).
        node = lax.broadcasted_iota(jnp.int32, (N, 2 * width), 0)
        onehot = (node == jnp.concatenate([idx0, idx1], axis=1)
                  ).astype(onehot_dtype)
        ab = lax.dot_general(
            zT_ref[...], onehot,
            dimension_numbers=(((1,), (0,)), ((), ())),
            preferred_element_type=jnp.float32)                # (D, 2*width)
        a, b = ab[:, :width], ab[:, width:]
        a_l, b_l = a[D - 1:D, :], b[D - 1:D, :]
        # UHG signature [1, ..., 1, -1]: full Euclidean reductions corrected
        # with the last feature row (no per-element sign multiplies).
        dot = jnp.sum(a * b, axis=0, keepdims=True) - 2.0 * a_l * b_l
        na = jnp.sum(a * a, axis=0, keepdims=True) - 2.0 * a_l * a_l
        nb = jnp.sum(b * b, axis=0, keepdims=True) - 2.0 * b_l * b_l
        denom = jnp.maximum(jnp.abs(na * nb), EPS)
        return jnp.minimum(1.0 - dot * dot / denom, 10.0)

    # ---- per-chunk init (each parallel chunk owns its accumulators) ----
    @pl.when(step == 0)
    def _():
        pos_acc[...] = jnp.zeros_like(pos_acc)
        neg_acc[...] = jnp.zeros_like(neg_acc)
        cnt_acc[...] = jnp.zeros_like(cnt_acc)

    # ---- negative edges: exactly once, on chunk 0 / step 0 (one-off cost) ----
    @pl.when(jnp.logical_and(chunk == 0, step == 0))
    def _():
        neg_term = jnp.maximum(
            1.0 - quad_clamped(neg_ref[0:1, :], neg_ref[1:2, :]), 0.0)
        acc = neg_acc[...]
        for j in range(BN // _LANES):                  # lane-aligned chunks
            acc = acc + neg_term[:, j * _LANES:(j + 1) * _LANES]
        neg_acc[...] = acc

    # ---- positive-edge tile ----
    idx0 = edge_ref[0:1, :]                            # (1, TE) int32
    idx1 = edge_ref[1:2, :]
    valid = jnp.logical_and(idx0 < batch_size,
                            idx1 < batch_size).astype(jnp.float32)
    pq = quad_clamped(idx0, idx1) * valid              # (1, TE)

    p = pos_acc[...]
    c = cnt_acc[...]
    for j in range(TE // _LANES):                      # lane-aligned chunks
        sl = slice(j * _LANES, (j + 1) * _LANES)
        p = p + pq[:, sl]
        c = c + valid[:, sl]
    pos_acc[...] = p
    cnt_acc[...] = c

    # ---- per-chunk finalize: lane-dense partials, reduced in the wrapper ----
    @pl.when(step == pl.num_programs(1) - 1)
    def _():
        out_ref[0, 0:1, :] = pos_acc[...]
        out_ref[0, 1:2, :] = neg_acc[...]
        out_ref[0, 2:3, :] = cnt_acc[...]


def _build_call(D, N, TE, B_pad, n_chunks, tiles_per_chunk, vmem_limit,
                single_buffer, onehot_dtype):
    if single_buffer:
        # Grid-invariant blocks do not need double buffers.
        zT_spec = pl.BlockSpec((D, N), lambda c, i, bs: (0, 0),
                               pipeline_mode=pl.Buffered(1))
        neg_spec = pl.BlockSpec((2, B_pad), lambda c, i, bs: (0, 0),
                                pipeline_mode=pl.Buffered(1))
    else:
        zT_spec = pl.BlockSpec((D, N), lambda c, i, bs: (0, 0))
        neg_spec = pl.BlockSpec((2, B_pad), lambda c, i, bs: (0, 0))

    grid_spec = pltpu.PrefetchScalarGridSpec(
        num_scalar_prefetch=1,                          # batch_size in SMEM
        grid=(n_chunks, tiles_per_chunk),
        in_specs=[
            zT_spec,                                    # (D, N) VMEM-resident
            pl.BlockSpec((2, TE),
                         lambda c, i, bs: (0, c * tiles_per_chunk + i)),
            neg_spec,                                   # (2, B_pad) resident
        ],
        out_specs=pl.BlockSpec((1, 3, _LANES), lambda c, i, bs: (c, 0, 0)),
        scratch_shapes=[pltpu.VMEM((1, _LANES), jnp.float32)] * 3,
    )
    return pl.pallas_call(
        functools.partial(_uhg_loss_kernel, onehot_dtype),
        out_shape=jax.ShapeDtypeStruct((n_chunks, 3, _LANES), jnp.float32),
        grid_spec=grid_spec,
        compiler_params=pltpu.CompilerParams(
            dimension_semantics=("parallel", "arbitrary"),
            vmem_limit_bytes=int(vmem_limit)),
    )


def uhg_loss(z, edge_index, batch_size, neg_edge_index,
             spread_weight=0.1, quad_weight=1.0, edge_tile=2048):
    """JAX/Pallas equivalent of UHGLoss.forward.

    z:              (N, D) float32 embeddings (last coord is homogeneous).
    edge_index:     (2, E) int32 positive-candidate edges.
    batch_size:     int (or scalar) used for the validity mask.
    neg_edge_index: (2, B) int32 negative edges (caller-provided randomness).
    """
    N, D = z.shape
    E = int(edge_index.shape[1])
    num_neg = int(neg_edge_index.shape[1])
    if E == 0 or num_neg == 0:
        return jnp.zeros((), jnp.float32)

    B_pad = _round_up(num_neg, _LANES)

    # Generation-aware VMEM budget (v7x: 64 MiB -> ~48 MB; v5e/v6e: ~96 MB).
    try:
        phys_vmem = int(pltpu.get_tpu_info().vmem_capacity_bytes)
    except Exception:                      # unknown chip: assume small (v7x)
        phys_vmem = 64 * 1024 * 1024
    vmem_limit = min((phys_vmem * 3) // 4, 112 * 1024 * 1024)

    # Edge tile: as big as the VMEM budget allows (dominant per-edge cost is
    # the (N, 2*TE) bf16 one-hot + (D, 2*TE) f32 gather, with 2x safety),
    # capped by `edge_tile` and the padded edge count.
    fixed = 8 * D * N + 16 * B_pad + (2 << 20)
    per_edge = 16 + 8 * N + 16 * D + 64
    te_budget = max((vmem_limit - fixed) // per_edge, _LANES)
    tile_cap = max(_LANES, (int(edge_tile) // _LANES) * _LANES)
    e_ceil = _round_up(E, _LANES)
    TE = int(min(te_budget, tile_cap, e_ceil))
    TE = max((TE // _LANES) * _LANES, _LANES)

    # 2-D grid: outer "parallel" chunks (megacore split on v7x), inner
    # "arbitrary" accumulation steps.
    n_tiles = -(-E // TE)
    n_chunks = 2 if n_tiles >= 2 else 1
    n_tiles = _round_up(n_tiles, n_chunks)
    tiles_per_chunk = n_tiles // n_chunks
    E_pad = n_tiles * TE

    sentinel = jnp.iinfo(jnp.int32).max    # fails the mask, gathers zeros
    edge_i = edge_index.astype(jnp.int32)
    if E_pad != E:
        edge_i = jnp.concatenate(
            [edge_i, jnp.full((2, E_pad - E), sentinel, jnp.int32)], axis=1)
    neg_i = neg_edge_index.astype(jnp.int32)
    if B_pad != num_neg:
        # Padded negative columns gather the zero vector -> quadrance 1 ->
        # relu(1-1) = 0; we divide by the true count below.
        neg_i = jnp.concatenate(
            [neg_i, jnp.full((2, B_pad - num_neg), sentinel, jnp.int32)],
            axis=1)

    zT = z.astype(jnp.float32).T           # (D, N): features on sublanes
    bs_arr = jnp.asarray(batch_size, jnp.int32).reshape((1,))

    # Preferred config first; fall back if this jax build rejects
    # pl.Buffered(1) or the mixed f32 x bf16 matmul.
    configs = [(True, jnp.bfloat16), (True, jnp.float32), (False, jnp.float32)]
    if _WORKING_CONFIG:
        configs = [_WORKING_CONFIG[0]] + [c for c in configs
                                          if c != _WORKING_CONFIG[0]]
    out, last_err = None, None
    for cfg in configs:
        try:
            call = _build_call(D, N, TE, B_pad, n_chunks, tiles_per_chunk,
                               vmem_limit, *cfg)
            out = call(bs_arr, zT, edge_i, neg_i)
            if not _WORKING_CONFIG:
                _WORKING_CONFIG.append(cfg)
            break
        except Exception as err:           # pragma: no cover - fallback path
            last_err = err
    if out is None:
        raise last_err

    pos_sum = jnp.sum(out[:, 0, :])
    neg_sum = jnp.sum(out[:, 1, :])
    count = jnp.sum(out[:, 2, :])
    safe_count = jnp.maximum(count, 1.0)
    pos_loss = pos_sum / safe_count
    neg_loss = neg_sum / max(num_neg, 1)
    # spread uses the exact same formula as quadrance -> reuse pos_sum.
    spread_loss = spread_weight * (pos_sum / safe_count)
    total = jnp.clip(quad_weight * (pos_loss + neg_loss) + spread_loss,
                     0.0, 100.0)
    # PyTorch returns 0.0 when no positive edges survive the mask.
    return jnp.where(count > 0, total, 0.0)


def _uhg_loss_ref(z, edge_index, batch_size, neg_edge_index,
                  spread_weight=0.1, quad_weight=1.0):
    """Pure-JAX reference (mirrors the PyTorch module)."""
    def inner(a, b):
        return jnp.sum(a[..., :-1] * b[..., :-1], axis=-1) - a[..., -1] * b[..., -1]

    def norm(a):
        return jnp.sum(a[..., :-1] ** 2, axis=-1) - a[..., -1] ** 2

    def quad(a, b):
        dot = inner(a, b)
        denom = jnp.maximum(jnp.abs(norm(a) * norm(b)), EPS)
        return 1.0 - dot ** 2 / denom

    mask = (edge_index[0] < batch_size) & (edge_index[1] < batch_size)
    w = mask.astype(jnp.float32)
    cnt = jnp.sum(w)
    a_pos, b_pos = z[edge_index[0]], z[edge_index[1]]
    a_neg, b_neg = z[neg_edge_index[0]], z[neg_edge_index[1]]
    pos_quad = jnp.minimum(quad(a_pos, b_pos), 10.0)
    neg_quad = jnp.minimum(quad(a_neg, b_neg), 10.0)
    spread = jnp.minimum(quad(a_pos, b_pos), 10.0)
    safe = jnp.maximum(cnt, 1.0)
    pos_loss = jnp.sum(pos_quad * w) / safe
    neg_loss = jnp.mean(jnp.maximum(1.0 - neg_quad, 0.0))
    spread_loss = spread_weight * jnp.sum(spread * w) / safe
    total = jnp.clip(quad_weight * (pos_loss + neg_loss) + spread_loss,
                     0.0, 100.0)
    return jnp.where(cnt > 0, total, 0.0)


if __name__ == "__main__":
    key = jax.random.PRNGKey(0)
    k_z, k_e, k_n, k_z2, k_e2, k_n2 = jax.random.split(key, 6)

    # Case 1: multi-chunk, multi-step grid (TE=128 -> 4 tiles -> 2 parallel
    # chunks x 2 accumulation steps each).
    N, D, E, batch = 64, 16, 512, 32
    z = jax.random.normal(k_z, (N, D), dtype=jnp.float32)
    edge_index = jax.random.randint(k_e, (2, E), 0, N, dtype=jnp.int32)
    neg_edge_index = jax.random.randint(k_n, (2, batch), 0, batch,
                                        dtype=jnp.int32)

    loss = jax.block_until_ready(
        uhg_loss(z, edge_index, batch, neg_edge_index, edge_tile=128))
    ref = _uhg_loss_ref(z, edge_index, batch, neg_edge_index)
    assert jnp.allclose(loss, ref, atol=1e-5, rtol=5e-4), (loss, ref)

    # Case 2: ragged sizes (E not a lane multiple), single chunk / single tile,
    # default (VMEM-budgeted) edge tile.
    N2, D2, E2, batch2 = 40, 8, 200, 24
    z2 = jax.random.normal(k_z2, (N2, D2), dtype=jnp.float32)
    edge_index2 = jax.random.randint(k_e2, (2, E2), 0, N2, dtype=jnp.int32)
    neg_edge_index2 = jax.random.randint(k_n2, (2, batch2), 0, batch2,
                                         dtype=jnp.int32)

    loss2 = jax.block_until_ready(
        uhg_loss(z2, edge_index2, batch2, neg_edge_index2))
    ref2 = _uhg_loss_ref(z2, edge_index2, batch2, neg_edge_index2)
    assert jnp.allclose(loss2, ref2, atol=1e-5, rtol=5e-4), (loss2, ref2)

    print("KERNEL_OK")
</pallas_src>

<mosaic_0001>
module attributes {stable_mosaic.version = 11 : i64} {
  func.func @_uhg_loss_kernel(%arg0: i32, %arg1: i32, %arg2: memref<1xi32, #tpu.memory_space<smem>>, %arg3: memref<16x64xf32, #tpu.memory_space<vmem>>, %arg4: memref<2x128xi32, #tpu.memory_space<vmem>>, %arg5: memref<2x128xi32, #tpu.memory_space<vmem>>, %arg6: memref<1x3x128xf32, #tpu.memory_space<vmem>>, %arg7: memref<1x128xf32, #tpu.memory_space<vmem>>, %arg8: memref<1x128xf32, #tpu.memory_space<vmem>>, %arg9: memref<1x128xf32, #tpu.memory_space<vmem>>) attributes {dimension_semantics = [#tpu.dimension_semantics<parallel>, #tpu.dimension_semantics<arbitrary>], iteration_bounds = array<i64: 2, 2>, scalar_prefetch = 1 : i64, scratch_operands = 3 : i64, tpu.core_type = #tpu.core_type<tc>, window_params = [{pipeline_mode = #tpu.pipeline_mode<synchronous>, transform_indices = @transform_0, window_bounds = array<i64: 16, 64>}, {transform_indices = @transform_1, window_bounds = array<i64: 2, 128>}, {pipeline_mode = #tpu.pipeline_mode<synchronous>, transform_indices = @transform_2, window_bounds = array<i64: 2, 128>}, {transform_indices = @transform_3, window_bounds = array<i64: 1, 3, 128>}]} {
    %c0 = arith.constant 0 : index
    %0 = memref.load %arg2[%c0] : memref<1xi32, #tpu.memory_space<smem>>
    %c0_i32 = arith.constant 0 : i32
    %1 = arith.cmpi eq, %arg1, %c0_i32 : i32
    %2 = arith.extui %1 : i1 to i32
    %c0_i32_0 = arith.constant 0 : i32
    %3 = arith.cmpi ne, %2, %c0_i32_0 : i32
    scf.if %3 {
      %cst_27 = arith.constant 0.000000e+00 : f32
      %72 = vector.broadcast %cst_27 : f32 to vector<1x128xf32>
      %c0_28 = arith.constant 0 : index
      %c0_29 = arith.constant 0 : index
      %73 = vector.load %arg7[%c0_28, %c0_29] : memref<1x128xf32, #tpu.memory_space<vmem>>, vector<1x128xf32>
      tpu.vector_store %arg7[%c0_28, %c0_29], %72 {strides = array<i32>} : memref<1x128xf32, #tpu.memory_space<vmem>>, vector<1x128xf32>,
      %cst_30 = arith.constant 0.000000e+00 : f32
      %74 = vector.broadcast %cst_30 : f32 to vector<1x128xf32>
      %c0_31 = arith.constant 0 : index
      %c0_32 = arith.constant 0 : index
      %75 = vector.load %arg8[%c0_31, %c0_32] : memref<1x128xf32, #tpu.memory_space<vmem>>, vector<1x128xf32>
      tpu.vector_store %arg8[%c0_31, %c0_32], %74 {strides = array<i32>} : memref<1x128xf32, #tpu.memory_space<vmem>>, vector<1x128xf32>,
      %cst_33 = arith.constant 0.000000e+00 : f32
      %76 = vector.broadcast %cst_33 : f32 to vector<1x128xf32>
      %c0_34 = arith.constant 0 : index
      %c0_35 = arith.constant 0 : index
      %77 = vector.load %arg9[%c0_34, %c0_35] : memref<1x128xf32, #tpu.memory_space<vmem>>, vector<1x128xf32>
      tpu.vector_store %arg9[%c0_34, %c0_35], %76 {strides = array<i32>} : memref<1x128xf32, #tpu.memory_space<vmem>>, vector<1x128xf32>,
    } else {
    }
    %c0_i32_1 = arith.constant 0 : i32
    %4 = arith.cmpi eq, %arg0, %c0_i32_1 : i32
    %c0_i32_2 = arith.constant 0 : i32
    %5 = arith.cmpi eq, %arg1, %c0_i32_2 : i32
    %6 = arith.andi %4, %5 : i1
    %7 = arith.extui %6 : i1 to i32
    %c0_i32_3 = arith.constant 0 : i32
    %8 = arith.cmpi ne, %7, %c0_i32_3 : i32
    scf.if %8 {
      %c0_27 = arith.constant 0 : index
      %c0_28 = arith.constant 0 : index
      %72 = vector.load %arg5[%c0_27, %c0_28] : memref<2x128xi32, #tpu.memory_space<vmem>>, vector<1x128xi32>
      %c1_29 = arith.constant 1 : index
      %c0_30 = arith.constant 0 : index
      %73 = vector.load %arg5[%c1_29, %c0_30] : memref<2x128xi32, #tpu.memory_space<vmem>>, vector<1x128xi32>
      %74 = tpu.iota {dimensions = array<i32: 0>} : vector<64x256xi32>
      %75 = tpu.concatenate %72, %73 in 1 : vector<1x128xi32>, vector<1x128xi32> -> vector<1x256xi32>
      %76 = vector.broadcast %75 : vector<1x256xi32> to vector<64x256xi32>
      %77 = arith.cmpi eq, %74, %76 : vector<64x256xi32>
      %78 = arith.extui %77 : vector<64x256xi1> to vector<64x256xi32>
      %79 = arith.sitofp %78 : vector<64x256xi32> to vector<64x256xf32>
      %80 = arith.truncf %79 : vector<64x256xf32> to vector<64x256xbf16>
      %c0_31 = arith.constant 0 : index
      %c0_32 = arith.constant 0 : index
      %81 = vector.load %arg3[%c0_31, %c0_32] : memref<16x64xf32, #tpu.memory_space<vmem>>, vector<16x64xf32>
      %cst_33 = arith.constant dense<0.000000e+00> : vector<16x256xf32>
      %82 = tpu.matmul %81, %80, %cst_33 {dimension_numbers = #tpu.dot_dimension_numbers<[1], [0], [0], [1], [0, 0, 1, 1], [], []>} : vector<16x64xf32>, vector<64x256xbf16>, vector<16x256xf32> -> vector<16x256xf32>
      %83 = vector.extract_strided_slice %82 {offsets = [0, 0], sizes = [16, 128], strides = [1, 1]} : vector<16x256xf32> to vector<16x128xf32>
      %84 = vector.extract_strided_slice %82 {offsets = [0, 128], sizes = [16, 128], strides = [1, 1]} : vector<16x256xf32> to vector<16x128xf32>
      %85 = vector.extract_strided_slice %83 {offsets = [15, 0], sizes = [1, 128], strides = [1, 1]} : vector<16x128xf32> to vector<1x128xf32>
      %86 = vector.extract_strided_slice %84 {offsets = [15, 0], sizes = [1, 128], strides = [1, 1]} : vector<16x128xf32> to vector<1x128xf32>
      %87 = arith.mulf %83, %84 : vector<16x128xf32>
      %cst_34 = arith.constant dense<0.000000e+00> : vector<128xf32>
      %88 = vector.multi_reduction <add>, %87, %cst_34 [0] : vector<16x128xf32> to vector<128xf32>
      %89 = vector.shape_cast %88 : vector<128xf32> to vector<1x128xf32>
      %cst_35 = arith.constant 2.000000e+00 : f32
      %90 = vector.broadcast %cst_35 : f32 to vector<1x128xf32>
      %91 = arith.mulf %90, %85 : vector<1x128xf32>
      %92 = arith.mulf %91, %86 : vector<1x128xf32>
      %93 = arith.subf %89, %92 : vector<1x128xf32>
      %94 = arith.mulf %83, %83 : vector<16x128xf32>
      %cst_36 = arith.constant dense<0.000000e+00> : vector<128xf32>
      %95 = vector.multi_reduction <add>, %94, %cst_36 [0] : vector<16x128xf32> to vector<128xf32>
      %96 = vector.shape_cast %95 : vector<128xf32> to vector<1x128xf32>
      %cst_37 = arith.constant 2.000000e+00 : f32
      %97 = vector.broadcast %cst_37 : f32 to vector<1x128xf32>
      %98 = arith.mulf %97, %85 : vector<1x128xf32>
      %99 = arith.mulf %98, %85 : vector<1x128xf32>
      %100 = arith.subf %96, %99 : vector<1x128xf32>
      %101 = arith.mulf %84, %84 : vector<16x128xf32>
      %cst_38 = arith.constant dense<0.000000e+00> : vector<128xf32>
      %102 = vector.multi_reduction <add>, %101, %cst_38 [0] : vector<16x128xf32> to vector<128xf32>
      %103 = vector.shape_cast %102 : vector<128xf32> to vector<1x128xf32>
      %cst_39 = arith.constant 2.000000e+00 : f32
      %104 = vector.broadcast %cst_39 : f32 to vector<1x128xf32>
      %105 = arith.mulf %104, %86 : vector<1x128xf32>
      %106 = arith.mulf %105, %86 : vector<1x128xf32>
      %107 = arith.subf %103, %106 : vector<1x128xf32>
      %108 = arith.mulf %100, %107 : vector<1x128xf32>
      %109 = math.absf %108 : vector<1x128xf32>
      %cst_40 = arith.constant 9.99999971E-10 : f32
      %110 = vector.broadcast %cst_40 : f32 to vector<1x128xf32>
      %111 = arith.maximumf %109, %110 : vector<1x128xf32>
      %112 = arith.mulf %93, %93 : vector<1x128xf32>
      %113 = arith.divf %112, %111 : vector<1x128xf32>
      %cst_41 = arith.constant 1.000000e+00 : f32
      %114 = vector.broadcast %cst_41 : f32 to vector<1x128xf32>
      %115 = arith.subf %114, %113 : vector<1x128xf32>
      %cst_42 = arith.constant 1.000000e+01 : f32
      %116 = vector.broadcast %cst_42 : f32 to vector<1x128xf32>
      %117 = arith.minimumf %115, %116 : vector<1x128xf32>
      %cst_43 = arith.constant 1.000000e+00 : f32
      %118 = vector.broadcast %cst_43 : f32 to vector<1x128xf32>
      %119 = arith.subf %118, %117 : vector<1x128xf32>
      %cst_44 = arith.constant 0.000000e+00 : f32
      %120 = vector.broadcast %cst_44 : f32 to vector<1x128xf32>
      %121 = arith.maximumf %119, %120 : vector<1x128xf32>
      %c0_45 = arith.constant 0 : index
      %c0_46 = arith.constant 0 : index
      %122 = vector.load %arg8[%c0_45, %c0_46] : memref<1x128xf32, #tpu.memory_space<vmem>>, vector<1x128xf32>
      %123 = arith.addf %122, %121 : vector<1x128xf32>
      %c0_47 = arith.constant 0 : index
      %c0_48 = arith.constant 0 : index
      %124 = vector.load %arg8[%c0_47, %c0_48] : memref<1x128xf32, #tpu.memory_space<vmem>>, vector<1x128xf32>
      tpu.vector_store %arg8[%c0_47, %c0_48], %123 {strides = array<i32>} : memref<1x128xf32, #tpu.memory_space<vmem>>, vector<1x128xf32>,
    } else {
    }
    %c0_4 = arith.constant 0 : index
    %c0_5 = arith.constant 0 : index
    %9 = vector.load %arg4[%c0_4, %c0_5] : memref<2x128xi32, #tpu.memory_space<vmem>>, vector<1x128xi32>
    %c1 = arith.constant 1 : index
    %c0_6 = arith.constant 0 : index
    %10 = vector.load %arg4[%c1, %c0_6] : memref<2x128xi32, #tpu.memory_space<vmem>>, vector<1x128xi32>
    %11 = vector.broadcast %0 : i32 to vector<1x128xi32>
    %12 = arith.cmpi slt, %9, %11 : vector<1x128xi32>
    %13 = vector.broadcast %0 : i32 to vector<1x128xi32>
    %14 = arith.cmpi slt, %10, %13 : vector<1x128xi32>
    %15 = arith.andi %12, %14 : vector<1x128xi1>
    %16 = arith.extui %15 : vector<1x128xi1> to vector<1x128xi32>
    %17 = arith.sitofp %16 : vector<1x128xi32> to vector<1x128xf32>
    %18 = tpu.iota {dimensions = array<i32: 0>} : vector<64x256xi32>
    %19 = tpu.concatenate %9, %10 in 1 : vector<1x128xi32>, vector<1x128xi32> -> vector<1x256xi32>
    %20 = vector.broadcast %19 : vector<1x256xi32> to vector<64x256xi32>
    %21 = arith.cmpi eq, %18, %20 : vector<64x256xi32>
    %22 = arith.extui %21 : vector<64x256xi1> to vector<64x256xi32>
    %23 = arith.sitofp %22 : vector<64x256xi32> to vector<64x256xf32>
    %24 = arith.truncf %23 : vector<64x256xf32> to vector<64x256xbf16>
    %c0_7 = arith.constant 0 : index
    %c0_8 = arith.constant 0 : index
    %25 = vector.load %arg3[%c0_7, %c0_8] : memref<16x64xf32, #tpu.memory_space<vmem>>, vector<16x64xf32>
    %cst = arith.constant dense<0.000000e+00> : vector<16x256xf32>
    %26 = tpu.matmul %25, %24, %cst {dimension_numbers = #tpu.dot_dimension_numbers<[1], [0], [0], [1], [0, 0, 1, 1], [], []>} : vector<16x64xf32>, vector<64x256xbf16>, vector<16x256xf32> -> vector<16x256xf32>
    %27 = vector.extract_strided_slice %26 {offsets = [0, 0], sizes = [16, 128], strides = [1, 1]} : vector<16x256xf32> to vector<16x128xf32>
    %28 = vector.extract_strided_slice %26 {offsets = [0, 128], sizes = [16, 128], strides = [1, 1]} : vector<16x256xf32> to vector<16x128xf32>
    %29 = vector.extract_strided_slice %27 {offsets = [15, 0], sizes = [1, 128], strides = [1, 1]} : vector<16x128xf32> to vector<1x128xf32>
    %30 = vector.extract_strided_slice %28 {offsets = [15, 0], sizes = [1, 128], strides = [1, 1]} : vector<16x128xf32> to vector<1x128xf32>
    %31 = arith.mulf %27, %28 : vector<16x128xf32>
    %cst_9 = arith.constant dense<0.000000e+00> : vector<128xf32>
    %32 = vector.multi_reduction <add>, %31, %cst_9 [0] : vector<16x128xf32> to vector<128xf32>
    %33 = vector.shape_cast %32 : vector<128xf32> to vector<1x128xf32>
    %cst_10 = arith.constant 2.000000e+00 : f32
    %34 = vector.broadcast %cst_10 : f32 to vector<1x128xf32>
    %35 = arith.mulf %34, %29 : vector<1x128xf32>
    %36 = arith.mulf %35, %30 : vector<1x128xf32>
    %37 = arith.subf %33, %36 : vector<1x128xf32>
    %38 = arith.mulf %27, %27 : vector<16x128xf32>
    %cst_11 = arith.constant dense<0.000000e+00> : vector<128xf32>
    %39 = vector.multi_reduction <add>, %38, %cst_11 [0] : vector<16x128xf32> to vector<128xf32>
    %40 = vector.shape_cast %39 : vector<128xf32> to vector<1x128xf32>
    %cst_12 = arith.constant 2.000000e+00 : f32
    %41 = vector.broadcast %cst_12 : f32 to vector<1x128xf32>
    %42 = arith.mulf %41, %29 : vector<1x128xf32>
    %43 = arith.mulf %42, %29 : vector<1x128xf32>
    %44 = arith.subf %40, %43 : vector<1x128xf32>
    %45 = arith.mulf %28, %28 : vector<16x128xf32>
    %cst_13 = arith.constant dense<0.000000e+00> : vector<128xf32>
    %46 = vector.multi_reduction <add>, %45, %cst_13 [0] : vector<16x128xf32> to vector<128xf32>
    %47 = vector.shape_cast %46 : vector<128xf32> to vector<1x128xf32>
    %cst_14 = arith.constant 2.000000e+00 : f32
    %48 = vector.broadcast %cst_14 : f32 to vector<1x128xf32>
    %49 = arith.mulf %48, %30 : vector<1x128xf32>
    %50 = arith.mulf %49, %30 : vector<1x128xf32>
    %51 = arith.subf %47, %50 : vector<1x128xf32>
    %52 = arith.mulf %44, %51 : vector<1x128xf32>
    %53 = math.absf %52 : vector<1x128xf32>
    %cst_15 = arith.constant 9.99999971E-10 : f32
    %54 = vector.broadcast %cst_15 : f32 to vector<1x128xf32>
    %55 = arith.maximumf %53, %54 : vector<1x128xf32>
    %56 = arith.mulf %37, %37 : vector<1x128xf32>
    %57 = arith.divf %56, %55 : vector<1x128xf32>
    %cst_16 = arith.constant 1.000000e+00 : f32
    %58 = vector.broadcast %cst_16 : f32 to vector<1x128xf32>
    %59 = arith.subf %58, %57 : vector<1x128xf32>
    %cst_17 = arith.constant 1.000000e+01 : f32
    %60 = vector.broadcast %cst_17 : f32 to vector<1x128xf32>
    %61 = arith.minimumf %59, %60 : vector<1x128xf32>
    %62 = arith.mulf %61, %17 : vector<1x128xf32>
    %c0_18 = arith.constant 0 : index
    %c0_19 = arith.constant 0 : index
    %63 = vector.load %arg7[%c0_18, %c0_19] : memref<1x128xf32, #tpu.memory_space<vmem>>, vector<1x128xf32>
    %c0_20 = arith.constant 0 : index
    %c0_21 = arith.constant 0 : index
    %64 = vector.load %arg9[%c0_20, %c0_21] : memref<1x128xf32, #tpu.memory_space<vmem>>, vector<1x128xf32>
    %65 = arith.addf %63, %62 : vector<1x128xf32>
    %66 = arith.addf %64, %17 : vector<1x128xf32>
    %c0_22 = arith.constant 0 : index
    %c0_23 = arith.constant 0 : index
    %67 = vector.load %arg7[%c0_22, %c0_23] : memref<1x128xf32, #tpu.memory_space<vmem>>, vector<1x128xf32>
    tpu.vector_store %arg7[%c0_22, %c0_23], %65 {strides = array<i32>} : memref<1x128xf32, #tpu.memory_space<vmem>>, vector<1x128xf32>,
    %c0_24 = arith.constant 0 : index
    %c0_25 = arith.constant 0 : index
    %68 = vector.load %arg9[%c0_24, %c0_25] : memref<1x128xf32, #tpu.memory_space<vmem>>, vector<1x128xf32>
    tpu.vector_store %arg9[%c0_24, %c0_25], %66 {strides = array<i32>} : memref<1x128xf32, #tpu.memory_space<vmem>>, vector<1x128xf32>,
    %c1_i32 = arith.constant 1 : i32
    %69 = arith.cmpi eq, %arg1, %c1_i32 : i32
    %70 = arith.extui %69 : i1 to i32
    %c0_i32_26 = arith.constant 0 : i32
    %71 = arith.cmpi ne, %70, %c0_i32_26 : i32
    scf.if %71 {
      %c0_27 = arith.constant 0 : index
      %c0_28 = arith.constant 0 : index
      %72 = vector.load %arg7[%c0_27, %c0_28] : memref<1x128xf32, #tpu.memory_space<vmem>>, vector<1x128xf32>
      %c0_29 = arith.constant 0 : index
      %c0_30 = arith.constant 0 : index
      %c0_31 = arith.constant 0 : index
      %73 = vector.load %arg6[%c0_29, %c0_30, %c0_31] : memref<1x3x128xf32, #tpu.memory_space<vmem>>, vector<1x1x128xf32>
      %74 = vector.shape_cast %73 : vector<1x1x128xf32> to vector<1x128xf32>
      %75 = vector.shape_cast %72 : vector<1x128xf32> to vector<1x1x128xf32>
      tpu.vector_store %arg6[%c0_29, %c0_30, %c0_31], %75 {strides = array<i32>} : memref<1x3x128xf32, #tpu.memory_space<vmem>>, vector<1x1x128xf32>,
      %c0_32 = arith.constant 0 : index
      %c0_33 = arith.constant 0 : index
      %76 = vector.load %arg8[%c0_32, %c0_33] : memref<1x128xf32, #tpu.memory_space<vmem>>, vector<1x128xf32>
      %c0_34 = arith.constant 0 : index
      %c1_35 = arith.constant 1 : index
      %c0_36 = arith.constant 0 : index
      %77 = vector.load %arg6[%c0_34, %c1_35, %c0_36] : memref<1x3x128xf32, #tpu.memory_space<vmem>>, vector<1x1x128xf32>
      %78 = vector.shape_cast %77 : vector<1x1x128xf32> to vector<1x128xf32>
      %79 = vector.shape_cast %76 : vector<1x128xf32> to vector<1x1x128xf32>
      tpu.vector_store %arg6[%c0_34, %c1_35, %c0_36], %79 {strides = array<i32>} : memref<1x3x128xf32, #tpu.memory_space<vmem>>, vector<1x1x128xf32>,
      %c0_37 = arith.constant 0 : index
      %c0_38 = arith.constant 0 : index
      %80 = vector.load %arg9[%c0_37, %c0_38] : memref<1x128xf32, #tpu.memory_space<vmem>>, vector<1x128xf32>
      %c0_39 = arith.constant 0 : index
      %c2 = arith.constant 2 : index
      %c0_40 = arith.constant 0 : index
      %81 = vector.load %arg6[%c0_39, %c2, %c0_40] : memref<1x3x128xf32, #tpu.memory_space<vmem>>, vector<1x1x128xf32>
      %82 = vector.shape_cast %81 : vector<1x1x128xf32> to vector<1x128xf32>
      %83 = vector.shape_cast %80 : vector<1x128xf32> to vector<1x1x128xf32>
      tpu.vector_store %arg6[%c0_39, %c2, %c0_40], %83 {strides = array<i32>} : memref<1x3x128xf32, #tpu.memory_space<vmem>>, vector<1x1x128xf32>,
    } else {
    }
    return
  }
  func.func @transform_0(%arg0: i32, %arg1: i32, %arg2: memref<1xi32, #tpu.memory_space<smem>>) -> (i32, i32) {
    %c0_i32 = arith.constant 0 : i32
    %c0_i32_0 = arith.constant 0 : i32
    %c0_i32_1 = arith.constant 0 : i32
    return %c0_i32, %c0_i32_0 : i32, i32
  }
  func.func @transform_1(%arg0: i32, %arg1: i32, %arg2: memref<1xi32, #tpu.memory_space<smem>>) -> (i32, i32) {
    %c2_i32 = arith.constant 2 : i32
    %0 = arith.muli %arg0, %c2_i32 : i32
    %1 = arith.addi %0, %arg1 : i32
    %c0_i32 = arith.constant 0 : i32
    %c0_i32_0 = arith.constant 0 : i32
    return %c0_i32, %1 : i32, i32
  }
  func.func @transform_2(%arg0: i32, %arg1: i32, %arg2: memref<1xi32, #tpu.memory_space<smem>>) -> (i32, i32) {
    %c0_i32 = arith.constant 0 : i32
    %c0_i32_0 = arith.constant 0 : i32
    %c0_i32_1 = arith.constant 0 : i32
    return %c0_i32, %c0_i32_0 : i32, i32
  }
  func.func @transform_3(%arg0: i32, %arg1: i32, %arg2: memref<1xi32, #tpu.memory_space<smem>>) -> (i32, i32, i32) {
    %c0_i32 = arith.constant 0 : i32
    %c0_i32_0 = arith.constant 0 : i32
    %c0_i32_1 = arith.constant 0 : i32
    return %arg0, %c0_i32, %c0_i32_0 : i32, i32, i32
  }
}

module attributes {stable_mosaic.version = 11 : i64} {
  func.func @_uhg_loss_kernel(%arg0: i32, %arg1: i32, %arg2: memref<1xi32, #tpu.memory_space<smem>>, %arg3: memref<16x64xf32, #tpu.memory_space<vmem>>, %arg4: memref<2x128xi32, #tpu.memory_space<vmem>>, %arg5: memref<2x128xi32, #tpu.memory_space<vmem>>, %arg6: memref<1x3x128xf32, #tpu.memory_space<vmem>>, %arg7: memref<1x128xf32, #tpu.memory_space<vmem>>, %arg8: memref<1x128xf32, #tpu.memory_space<vmem>>, %arg9: memref<1x128xf32, #tpu.memory_space<vmem>>) attributes {dimension_semantics = [#tpu.dimension_semantics<parallel>, #tpu.dimension_semantics<arbitrary>], iteration_bounds = array<i64: 2, 2>, scalar_prefetch = 1 : i64, scratch_operands = 3 : i64, tpu.core_type = #tpu.core_type<tc>, window_params = [{pipeline_mode = #tpu.pipeline_mode<synchronous>, transform_indices = @transform_0, window_bounds = array<i64: 16, 64>}, {transform_indices = @transform_1, window_bounds = array<i64: 2, 128>}, {pipeline_mode = #tpu.pipeline_mode<synchronous>, transform_indices = @transform_2, window_bounds = array<i64: 2, 128>}, {transform_indices = @transform_3, window_bounds = array<i64: 1, 3, 128>}]} {
    %c0 = arith.constant 0 : index
    %0 = memref.load %arg2[%c0] : memref<1xi32, #tpu.memory_space<smem>>
    %c0_i32 = arith.constant 0 : i32
    %1 = arith.cmpi eq, %arg1, %c0_i32 : i32
    %2 = arith.extui %1 : i1 to i32
    %c0_i32_0 = arith.constant 0 : i32
    %3 = arith.cmpi ne, %2, %c0_i32_0 : i32
    scf.if %3 {
      %cst_27 = arith.constant 0.000000e+00 : f32
      %71 = vector.broadcast %cst_27 : f32 to vector<1x128xf32>
      %c0_28 = arith.constant 0 : index
      %c0_29 = arith.constant 0 : index
      %72 = vector.load %arg7[%c0_28, %c0_29] : memref<1x128xf32, #tpu.memory_space<vmem>>, vector<1x128xf32>
      tpu.vector_store %arg7[%c0_28, %c0_29], %71 {strides = array<i32>} : memref<1x128xf32, #tpu.memory_space<vmem>>, vector<1x128xf32>,
      %cst_30 = arith.constant 0.000000e+00 : f32
      %73 = vector.broadcast %cst_30 : f32 to vector<1x128xf32>
      %c0_31 = arith.constant 0 : index
      %c0_32 = arith.constant 0 : index
      %74 = vector.load %arg8[%c0_31, %c0_32] : memref<1x128xf32, #tpu.memory_space<vmem>>, vector<1x128xf32>
      tpu.vector_store %arg8[%c0_31, %c0_32], %73 {strides = array<i32>} : memref<1x128xf32, #tpu.memory_space<vmem>>, vector<1x128xf32>,
      %cst_33 = arith.constant 0.000000e+00 : f32
      %75 = vector.broadcast %cst_33 : f32 to vector<1x128xf32>
      %c0_34 = arith.constant 0 : index
      %c0_35 = arith.constant 0 : index
      %76 = vector.load %arg9[%c0_34, %c0_35] : memref<1x128xf32, #tpu.memory_space<vmem>>, vector<1x128xf32>
      tpu.vector_store %arg9[%c0_34, %c0_35], %75 {strides = array<i32>} : memref<1x128xf32, #tpu.memory_space<vmem>>, vector<1x128xf32>,
    } else {
    }
    %c0_i32_1 = arith.constant 0 : i32
    %4 = arith.cmpi eq, %arg0, %c0_i32_1 : i32
    %c0_i32_2 = arith.constant 0 : i32
    %5 = arith.cmpi eq, %arg1, %c0_i32_2 : i32
    %6 = arith.andi %4, %5 : i1
    %7 = arith.extui %6 : i1 to i32
    %c0_i32_3 = arith.constant 0 : i32
    %8 = arith.cmpi ne, %7, %c0_i32_3 : i32
    scf.if %8 {
      %c0_27 = arith.constant 0 : index
      %c0_28 = arith.constant 0 : index
      %71 = vector.load %arg5[%c0_27, %c0_28] : memref<2x128xi32, #tpu.memory_space<vmem>>, vector<1x128xi32>
      %c1_29 = arith.constant 1 : index
      %c0_30 = arith.constant 0 : index
      %72 = vector.load %arg5[%c1_29, %c0_30] : memref<2x128xi32, #tpu.memory_space<vmem>>, vector<1x128xi32>
      %73 = tpu.iota {dimensions = array<i32: 0>} : vector<64x256xi32>
      %74 = tpu.concatenate %71, %72 in 1 : vector<1x128xi32>, vector<1x128xi32> -> vector<1x256xi32>
      %75 = vector.broadcast %74 : vector<1x256xi32> to vector<64x256xi32>
      %76 = arith.cmpi eq, %73, %75 : vector<64x256xi32>
      %77 = arith.extui %76 : vector<64x256xi1> to vector<64x256xi32>
      %78 = arith.sitofp %77 : vector<64x256xi32> to vector<64x256xf32>
      %c0_31 = arith.constant 0 : index
      %c0_32 = arith.constant 0 : index
      %79 = vector.load %arg3[%c0_31, %c0_32] : memref<16x64xf32, #tpu.memory_space<vmem>>, vector<16x64xf32>
      %cst_33 = arith.constant dense<0.000000e+00> : vector<16x256xf32>
      %80 = tpu.matmul %79, %78, %cst_33 {dimension_numbers = #tpu.dot_dimension_numbers<[1], [0], [0], [1], [0, 0, 1, 1], [], []>} : vector<16x64xf32>, vector<64x256xf32>, vector<16x256xf32> -> vector<16x256xf32>
      %81 = vector.extract_strided_slice %80 {offsets = [0, 0], sizes = [16, 128], strides = [1, 1]} : vector<16x256xf32> to vector<16x128xf32>
      %82 = vector.extract_strided_slice %80 {offsets = [0, 128], sizes = [16, 128], strides = [1, 1]} : vector<16x256xf32> to vector<16x128xf32>
      %83 = vector.extract_strided_slice %81 {offsets = [15, 0], sizes = [1, 128], strides = [1, 1]} : vector<16x128xf32> to vector<1x128xf32>
      %84 = vector.extract_strided_slice %82 {offsets = [15, 0], sizes = [1, 128], strides = [1, 1]} : vector<16x128xf32> to vector<1x128xf32>
      %85 = arith.mulf %81, %82 : vector<16x128xf32>
      %cst_34 = arith.constant dense<0.000000e+00> : vector<128xf32>
      %86 = vector.multi_reduction <add>, %85, %cst_34 [0] : vector<16x128xf32> to vector<128xf32>
      %87 = vector.shape_cast %86 : vector<128xf32> to vector<1x128xf32>
      %cst_35 = arith.constant 2.000000e+00 : f32
      %88 = vector.broadcast %cst_35 : f32 to vector<1x128xf32>
      %89 = arith.mulf %88, %83 : vector<1x128xf32>
      %90 = arith.mulf %89, %84 : vector<1x128xf32>
      %91 = arith.subf %87, %90 : vector<1x128xf32>
      %92 = arith.mulf %81, %81 : vector<16x128xf32>
      %cst_36 = arith.constant dense<0.000000e+00> : vector<128xf32>
      %93 = vector.multi_reduction <add>, %92, %cst_36 [0] : vector<16x128xf32> to vector<128xf32>
      %94 = vector.shape_cast %93 : vector<128xf32> to vector<1x128xf32>
      %cst_37 = arith.constant 2.000000e+00 : f32
      %95 = vector.broadcast %cst_37 : f32 to vector<1x128xf32>
      %96 = arith.mulf %95, %83 : vector<1x128xf32>
      %97 = arith.mulf %96, %83 : vector<1x128xf32>
      %98 = arith.subf %94, %97 : vector<1x128xf32>
      %99 = arith.mulf %82, %82 : vector<16x128xf32>
      %cst_38 = arith.constant dense<0.000000e+00> : vector<128xf32>
      %100 = vector.multi_reduction <add>, %99, %cst_38 [0] : vector<16x128xf32> to vector<128xf32>
      %101 = vector.shape_cast %100 : vector<128xf32> to vector<1x128xf32>
      %cst_39 = arith.constant 2.000000e+00 : f32
      %102 = vector.broadcast %cst_39 : f32 to vector<1x128xf32>
      %103 = arith.mulf %102, %84 : vector<1x128xf32>
      %104 = arith.mulf %103, %84 : vector<1x128xf32>
      %105 = arith.subf %101, %104 : vector<1x128xf32>
      %106 = arith.mulf %98, %105 : vector<1x128xf32>
      %107 = math.absf %106 : vector<1x128xf32>
      %cst_40 = arith.constant 9.99999971E-10 : f32
      %108 = vector.broadcast %cst_40 : f32 to vector<1x128xf32>
      %109 = arith.maximumf %107, %108 : vector<1x128xf32>
      %110 = arith.mulf %91, %91 : vector<1x128xf32>
      %111 = arith.divf %110, %109 : vector<1x128xf32>
      %cst_41 = arith.constant 1.000000e+00 : f32
      %112 = vector.broadcast %cst_41 : f32 to vector<1x128xf32>
      %113 = arith.subf %112, %111 : vector<1x128xf32>
      %cst_42 = arith.constant 1.000000e+01 : f32
      %114 = vector.broadcast %cst_42 : f32 to vector<1x128xf32>
      %115 = arith.minimumf %113, %114 : vector<1x128xf32>
      %cst_43 = arith.constant 1.000000e+00 : f32
      %116 = vector.broadcast %cst_43 : f32 to vector<1x128xf32>
      %117 = arith.subf %116, %115 : vector<1x128xf32>
      %cst_44 = arith.constant 0.000000e+00 : f32
      %118 = vector.broadcast %cst_44 : f32 to vector<1x128xf32>
      %119 = arith.maximumf %117, %118 : vector<1x128xf32>
      %c0_45 = arith.constant 0 : index
      %c0_46 = arith.constant 0 : index
      %120 = vector.load %arg8[%c0_45, %c0_46] : memref<1x128xf32, #tpu.memory_space<vmem>>, vector<1x128xf32>
      %121 = arith.addf %120, %119 : vector<1x128xf32>
      %c0_47 = arith.constant 0 : index
      %c0_48 = arith.constant 0 : index
      %122 = vector.load %arg8[%c0_47, %c0_48] : memref<1x128xf32, #tpu.memory_space<vmem>>, vector<1x128xf32>
      tpu.vector_store %arg8[%c0_47, %c0_48], %121 {strides = array<i32>} : memref<1x128xf32, #tpu.memory_space<vmem>>, vector<1x128xf32>,
    } else {
    }
    %c0_4 = arith.constant 0 : index
    %c0_5 = arith.constant 0 : index
    %9 = vector.load %arg4[%c0_4, %c0_5] : memref<2x128xi32, #tpu.memory_space<vmem>>, vector<1x128xi32>
    %c1 = arith.constant 1 : index
    %c0_6 = arith.constant 0 : index
    %10 = vector.load %arg4[%c1, %c0_6] : memref<2x128xi32, #tpu.memory_space<vmem>>, vector<1x128xi32>
    %11 = vector.broadcast %0 : i32 to vector<1x128xi32>
    %12 = arith.cmpi slt, %9, %11 : vector<1x128xi32>
    %13 = vector.broadcast %0 : i32 to vector<1x128xi32>
    %14 = arith.cmpi slt, %10, %13 : vector<1x128xi32>
    %15 = arith.andi %12, %14 : vector<1x128xi1>
    %16 = arith.extui %15 : vector<1x128xi1> to vector<1x128xi32>
    %17 = arith.sitofp %16 : vector<1x128xi32> to vector<1x128xf32>
    %18 = tpu.iota {dimensions = array<i32: 0>} : vector<64x256xi32>
    %19 = tpu.concatenate %9, %10 in 1 : vector<1x128xi32>, vector<1x128xi32> -> vector<1x256xi32>
    %20 = vector.broadcast %19 : vector<1x256xi32> to vector<64x256xi32>
    %21 = arith.cmpi eq, %18, %20 : vector<64x256xi32>
    %22 = arith.extui %21 : vector<64x256xi1> to vector<64x256xi32>
    %23 = arith.sitofp %22 : vector<64x256xi32> to vector<64x256xf32>
    %c0_7 = arith.constant 0 : index
    %c0_8 = arith.constant 0 : index
    %24 = vector.load %arg3[%c0_7, %c0_8] : memref<16x64xf32, #tpu.memory_space<vmem>>, vector<16x64xf32>
    %cst = arith.constant dense<0.000000e+00> : vector<16x256xf32>
    %25 = tpu.matmul %24, %23, %cst {dimension_numbers = #tpu.dot_dimension_numbers<[1], [0], [0], [1], [0, 0, 1, 1], [], []>} : vector<16x64xf32>, vector<64x256xf32>, vector<16x256xf32> -> vector<16x256xf32>
    %26 = vector.extract_strided_slice %25 {offsets = [0, 0], sizes = [16, 128], strides = [1, 1]} : vector<16x256xf32> to vector<16x128xf32>
    %27 = vector.extract_strided_slice %25 {offsets = [0, 128], sizes = [16, 128], strides = [1, 1]} : vector<16x256xf32> to vector<16x128xf32>
    %28 = vector.extract_strided_slice %26 {offsets = [15, 0], sizes = [1, 128], strides = [1, 1]} : vector<16x128xf32> to vector<1x128xf32>
    %29 = vector.extract_strided_slice %27 {offsets = [15, 0], sizes = [1, 128], strides = [1, 1]} : vector<16x128xf32> to vector<1x128xf32>
    %30 = arith.mulf %26, %27 : vector<16x128xf32>
    %cst_9 = arith.constant dense<0.000000e+00> : vector<128xf32>
    %31 = vector.multi_reduction <add>, %30, %cst_9 [0] : vector<16x128xf32> to vector<128xf32>
    %32 = vector.shape_cast %31 : vector<128xf32> to vector<1x128xf32>
    %cst_10 = arith.constant 2.000000e+00 : f32
    %33 = vector.broadcast %cst_10 : f32 to vector<1x128xf32>
    %34 = arith.mulf %33, %28 : vector<1x128xf32>
    %35 = arith.mulf %34, %29 : vector<1x128xf32>
    %36 = arith.subf %32, %35 : vector<1x128xf32>
    %37 = arith.mulf %26, %26 : vector<16x128xf32>
    %cst_11 = arith.constant dense<0.000000e+00> : vector<128xf32>
    %38 = vector.multi_reduction <add>, %37, %cst_11 [0] : vector<16x128xf32> to vector<128xf32>
    %39 = vector.shape_cast %38 : vector<128xf32> to vector<1x128xf32>
    %cst_12 = arith.constant 2.000000e+00 : f32
    %40 = vector.broadcast %cst_12 : f32 to vector<1x128xf32>
    %41 = arith.mulf %40, %28 : vector<1x128xf32>
    %42 = arith.mulf %41, %28 : vector<1x128xf32>
    %43 = arith.subf %39, %42 : vector<1x128xf32>
    %44 = arith.mulf %27, %27 : vector<16x128xf32>
    %cst_13 = arith.constant dense<0.000000e+00> : vector<128xf32>
    %45 = vector.multi_reduction <add>, %44, %cst_13 [0] : vector<16x128xf32> to vector<128xf32>
    %46 = vector.shape_cast %45 : vector<128xf32> to vector<1x128xf32>
    %cst_14 = arith.constant 2.000000e+00 : f32
    %47 = vector.broadcast %cst_14 : f32 to vector<1x128xf32>
    %48 = arith.mulf %47, %29 : vector<1x128xf32>
    %49 = arith.mulf %48, %29 : vector<1x128xf32>
    %50 = arith.subf %46, %49 : vector<1x128xf32>
    %51 = arith.mulf %43, %50 : vector<1x128xf32>
    %52 = math.absf %51 : vector<1x128xf32>
    %cst_15 = arith.constant 9.99999971E-10 : f32
    %53 = vector.broadcast %cst_15 : f32 to vector<1x128xf32>
    %54 = arith.maximumf %52, %53 : vector<1x128xf32>
    %55 = arith.mulf %36, %36 : vector<1x128xf32>
    %56 = arith.divf %55, %54 : vector<1x128xf32>
    %cst_16 = arith.constant 1.000000e+00 : f32
    %57 = vector.broadcast %cst_16 : f32 to vector<1x128xf32>
    %58 = arith.subf %57, %56 : vector<1x128xf32>
    %cst_17 = arith.constant 1.000000e+01 : f32
    %59 = vector.broadcast %cst_17 : f32 to vector<1x128xf32>
    %60 = arith.minimumf %58, %59 : vector<1x128xf32>
    %61 = arith.mulf %60, %17 : vector<1x128xf32>
    %c0_18 = arith.constant 0 : index
    %c0_19 = arith.constant 0 : index
    %62 = vector.load %arg7[%c0_18, %c0_19] : memref<1x128xf32, #tpu.memory_space<vmem>>, vector<1x128xf32>
    %c0_20 = arith.constant 0 : index
    %c0_21 = arith.constant 0 : index
    %63 = vector.load %arg9[%c0_20, %c0_21] : memref<1x128xf32, #tpu.memory_space<vmem>>, vector<1x128xf32>
    %64 = arith.addf %62, %61 : vector<1x128xf32>
    %65 = arith.addf %63, %17 : vector<1x128xf32>
    %c0_22 = arith.constant 0 : index
    %c0_23 = arith.constant 0 : index
    %66 = vector.load %arg7[%c0_22, %c0_23] : memref<1x128xf32, #tpu.memory_space<vmem>>, vector<1x128xf32>
    tpu.vector_store %arg7[%c0_22, %c0_23], %64 {strides = array<i32>} : memref<1x128xf32, #tpu.memory_space<vmem>>, vector<1x128xf32>,
    %c0_24 = arith.constant 0 : index
    %c0_25 = arith.constant 0 : index
    %67 = vector.load %arg9[%c0_24, %c0_25] : memref<1x128xf32, #tpu.memory_space<vmem>>, vector<1x128xf32>
    tpu.vector_store %arg9[%c0_24, %c0_25], %65 {strides = array<i32>} : memref<1x128xf32, #tpu.memory_space<vmem>>, vector<1x128xf32>,
    %c1_i32 = arith.constant 1 : i32
    %68 = arith.cmpi eq, %arg1, %c1_i32 : i32
    %69 = arith.extui %68 : i1 to i32
    %c0_i32_26 = arith.constant 0 : i32
    %70 = arith.cmpi ne, %69, %c0_i32_26 : i32
    scf.if %70 {
      %c0_27 = arith.constant 0 : index
      %c0_28 = arith.constant 0 : index
      %71 = vector.load %arg7[%c0_27, %c0_28] : memref<1x128xf32, #tpu.memory_space<vmem>>, vector<1x128xf32>
      %c0_29 = arith.constant 0 : index
      %c0_30 = arith.constant 0 : index
      %c0_31 = arith.constant 0 : index
      %72 = vector.load %arg6[%c0_29, %c0_30, %c0_31] : memref<1x3x128xf32, #tpu.memory_space<vmem>>, vector<1x1x128xf32>
      %73 = vector.shape_cast %72 : vector<1x1x128xf32> to vector<1x128xf32>
      %74 = vector.shape_cast %71 : vector<1x128xf32> to vector<1x1x128xf32>
      tpu.vector_store %arg6[%c0_29, %c0_30, %c0_31], %74 {strides = array<i32>} : memref<1x3x128xf32, #tpu.memory_space<vmem>>, vector<1x1x128xf32>,
      %c0_32 = arith.constant 0 : index
      %c0_33 = arith.constant 0 : index
      %75 = vector.load %arg8[%c0_32, %c0_33] : memref<1x128xf32, #tpu.memory_space<vmem>>, vector<1x128xf32>
      %c0_34 = arith.constant 0 : index
      %c1_35 = arith.constant 1 : index
      %c0_36 = arith.constant 0 : index
      %76 = vector.load %arg6[%c0_34, %c1_35, %c0_36] : memref<1x3x128xf32, #tpu.memory_space<vmem>>, vector<1x1x128xf32>
      %77 = vector.shape_cast %76 : vector<1x1x128xf32> to vector<1x128xf32>
      %78 = vector.shape_cast %75 : vector<1x128xf32> to vector<1x1x128xf32>
      tpu.vector_store %arg6[%c0_34, %c1_35, %c0_36], %78 {strides = array<i32>} : memref<1x3x128xf32, #tpu.memory_space<vmem>>, vector<1x1x128xf32>,
      %c0_37 = arith.constant 0 : index
      %c0_38 = arith.constant 0 : index
      %79 = vector.load %arg9[%c0_37, %c0_38] : memref<1x128xf32, #tpu.memory_space<vmem>>, vector<1x128xf32>
      %c0_39 = arith.constant 0 : index
      %c2 = arith.constant 2 : index
      %c0_40 = arith.constant 0 : index
      %80 = vector.load %arg6[%c0_39, %c2, %c0_40] : memref<1x3x128xf32, #tpu.memory_space<vmem>>, vector<1x1x128xf32>
      %81 = vector.shape_cast %80 : vector<1x1x128xf32> to vector<1x128xf32>
      %82 = vector.shape_cast %79 : vector<1x128xf32> to vector<1x1x128xf32>
      tpu.vector_store %arg6[%c0_39, %c2, %c0_40], %82 {strides = array<i32>} : memref<1x3x128xf32, #tpu.memory_space<vmem>>, vector<1x1x128xf32>,
    } else {
    }
    return
  }
  func.func @transform_0(%arg0: i32, %arg1: i32, %arg2: memref<1xi32, #tpu.memory_space<smem>>) -> (i32, i32) {
    %c0_i32 = arith.constant 0 : i32
    %c0_i32_0 = arith.constant 0 : i32
    %c0_i32_1 = arith.constant 0 : i32
    return %c0_i32, %c0_i32_0 : i32, i32
  }
  func.func @transform_1(%arg0: i32, %arg1: i32, %arg2: memref<1xi32, #tpu.memory_space<smem>>) -> (i32, i32) {
    %c2_i32 = arith.constant 2 : i32
    %0 = arith.muli %arg0, %c2_i32 : i32
    %1 = arith.addi %0, %arg1 : i32
    %c0_i32 = arith.constant 0 : i32
    %c0_i32_0 = arith.constant 0 : i32
    return %c0_i32, %1 : i32, i32
  }
  func.func @transform_2(%arg0: i32, %arg1: i32, %arg2: memref<1xi32, #tpu.memory_space<smem>>) -> (i32, i32) {
    %c0_i32 = arith.constant 0 : i32
    %c0_i32_0 = arith.constant 0 : i32
    %c0_i32_1 = arith.constant 0 : i32
    return %c0_i32, %c0_i32_0 : i32, i32
  }
  func.func @transform_3(%arg0: i32, %arg1: i32, %arg2: memref<1xi32, #tpu.memory_space<smem>>) -> (i32, i32, i32) {
    %c0_i32 = arith.constant 0 : i32
    %c0_i32_0 = arith.constant 0 : i32
    %c0_i32_1 = arith.constant 0 : i32
    return %arg0, %c0_i32, %c0_i32_0 : i32, i32, i32
  }
}

module attributes {stable_mosaic.version = 11 : i64} {
  func.func @_uhg_loss_kernel(%arg0: i32, %arg1: i32, %arg2: memref<1xi32, #tpu.memory_space<smem>>, %arg3: memref<16x64xf32, #tpu.memory_space<vmem>>, %arg4: memref<2x128xi32, #tpu.memory_space<vmem>>, %arg5: memref<2x128xi32, #tpu.memory_space<vmem>>, %arg6: memref<1x3x128xf32, #tpu.memory_space<vmem>>, %arg7: memref<1x128xf32, #tpu.memory_space<vmem>>, %arg8: memref<1x128xf32, #tpu.memory_space<vmem>>, %arg9: memref<1x128xf32, #tpu.memory_space<vmem>>) attributes {dimension_semantics = [#tpu.dimension_semantics<parallel>, #tpu.dimension_semantics<arbitrary>], iteration_bounds = array<i64: 2, 2>, scalar_prefetch = 1 : i64, scratch_operands = 3 : i64, tpu.core_type = #tpu.core_type<tc>, window_params = [{pipeline_mode = #tpu.pipeline_mode<synchronous>, transform_indices = @transform_0, window_bounds = array<i64: 16, 64>}, {transform_indices = @transform_1, window_bounds = array<i64: 2, 128>}, {pipeline_mode = #tpu.pipeline_mode<synchronous>, transform_indices = @transform_2, window_bounds = array<i64: 2, 128>}, {transform_indices = @transform_3, window_bounds = array<i64: 1, 3, 128>}]} {
    %c0 = arith.constant 0 : index
    %0 = memref.load %arg2[%c0] : memref<1xi32, #tpu.memory_space<smem>>
    %c0_i32 = arith.constant 0 : i32
    %1 = arith.cmpi eq, %arg1, %c0_i32 : i32
    %2 = arith.extui %1 : i1 to i32
    %c0_i32_0 = arith.constant 0 : i32
    %3 = arith.cmpi ne, %2, %c0_i32_0 : i32
    scf.if %3 {
      %cst_27 = arith.constant 0.000000e+00 : f32
      %71 = vector.broadcast %cst_27 : f32 to vector<1x128xf32>
      %c0_28 = arith.constant 0 : index
      %c0_29 = arith.constant 0 : index
      %72 = vector.load %arg7[%c0_28, %c0_29] : memref<1x128xf32, #tpu.memory_space<vmem>>, vector<1x128xf32>
      tpu.vector_store %arg7[%c0_28, %c0_29], %71 {strides = array<i32>} : memref<1x128xf32, #tpu.memory_space<vmem>>, vector<1x128xf32>,
      %cst_30 = arith.constant 0.000000e+00 : f32
      %73 = vector.broadcast %cst_30 : f32 to vector<1x128xf32>
      %c0_31 = arith.constant 0 : index
      %c0_32 = arith.constant 0 : index
      %74 = vector.load %arg8[%c0_31, %c0_32] : memref<1x128xf32, #tpu.memory_space<vmem>>, vector<1x128xf32>
      tpu.vector_store %arg8[%c0_31, %c0_32], %73 {strides = array<i32>} : memref<1x128xf32, #tpu.memory_space<vmem>>, vector<1x128xf32>,
      %cst_33 = arith.constant 0.000000e+00 : f32
      %75 = vector.broadcast %cst_33 : f32 to vector<1x128xf32>
      %c0_34 = arith.constant 0 : index
      %c0_35 = arith.constant 0 : index
      %76 = vector.load %arg9[%c0_34, %c0_35] : memref<1x128xf32, #tpu.memory_space<vmem>>, vector<1x128xf32>
      tpu.vector_store %arg9[%c0_34, %c0_35], %75 {strides = array<i32>} : memref<1x128xf32, #tpu.memory_space<vmem>>, vector<1x128xf32>,
    } else {
    }
    %c0_i32_1 = arith.constant 0 : i32
    %4 = arith.cmpi eq, %arg0, %c0_i32_1 : i32
    %c0_i32_2 = arith.constant 0 : i32
    %5 = arith.cmpi eq, %arg1, %c0_i32_2 : i32
    %6 = arith.andi %4, %5 : i1
    %7 = arith.extui %6 : i1 to i32
    %c0_i32_3 = arith.constant 0 : i32
    %8 = arith.cmpi ne, %7, %c0_i32_3 : i32
    scf.if %8 {
      %c0_27 = arith.constant 0 : index
      %c0_28 = arith.constant 0 : index
      %71 = vector.load %arg5[%c0_27, %c0_28] : memref<2x128xi32, #tpu.memory_space<vmem>>, vector<1x128xi32>
      %c1_29 = arith.constant 1 : index
      %c0_30 = arith.constant 0 : index
      %72 = vector.load %arg5[%c1_29, %c0_30] : memref<2x128xi32, #tpu.memory_space<vmem>>, vector<1x128xi32>
      %73 = tpu.iota {dimensions = array<i32: 0>} : vector<64x256xi32>
      %74 = tpu.concatenate %71, %72 in 1 : vector<1x128xi32>, vector<1x128xi32> -> vector<1x256xi32>
      %75 = vector.broadcast %74 : vector<1x256xi32> to vector<64x256xi32>
      %76 = arith.cmpi eq, %73, %75 : vector<64x256xi32>
      %77 = arith.extui %76 : vector<64x256xi1> to vector<64x256xi32>
      %78 = arith.sitofp %77 : vector<64x256xi32> to vector<64x256xf32>
      %c0_31 = arith.constant 0 : index
      %c0_32 = arith.constant 0 : index
      %79 = vector.load %arg3[%c0_31, %c0_32] : memref<16x64xf32, #tpu.memory_space<vmem>>, vector<16x64xf32>
      %cst_33 = arith.constant dense<0.000000e+00> : vector<16x256xf32>
      %80 = tpu.matmul %79, %78, %cst_33 {dimension_numbers = #tpu.dot_dimension_numbers<[1], [0], [0], [1], [0, 0, 1, 1], [], []>} : vector<16x64xf32>, vector<64x256xf32>, vector<16x256xf32> -> vector<16x256xf32>
      %81 = vector.extract_strided_slice %80 {offsets = [0, 0], sizes = [16, 128], strides = [1, 1]} : vector<16x256xf32> to vector<16x128xf32>
      %82 = vector.extract_strided_slice %80 {offsets = [0, 128], sizes = [16, 128], strides = [1, 1]} : vector<16x256xf32> to vector<16x128xf32>
      %83 = vector.extract_strided_slice %81 {offsets = [15, 0], sizes = [1, 128], strides = [1, 1]} : vector<16x128xf32> to vector<1x128xf32>
      %84 = vector.extract_strided_slice %82 {offsets = [15, 0], sizes = [1, 128], strides = [1, 1]} : vector<16x128xf32> to vector<1x128xf32>
      %85 = arith.mulf %81, %82 : vector<16x128xf32>
      %cst_34 = arith.constant dense<0.000000e+00> : vector<128xf32>
      %86 = vector.multi_reduction <add>, %85, %cst_34 [0] : vector<16x128xf32> to vector<128xf32>
      %87 = vector.shape_cast %86 : vector<128xf32> to vector<1x128xf32>
      %cst_35 = arith.constant 2.000000e+00 : f32
      %88 = vector.broadcast %cst_35 : f32 to vector<1x128xf32>
      %89 = arith.mulf %88, %83 : vector<1x128xf32>
      %90 = arith.mulf %89, %84 : vector<1x128xf32>
      %91 = arith.subf %87, %90 : vector<1x128xf32>
      %92 = arith.mulf %81, %81 : vector<16x128xf32>
      %cst_36 = arith.constant dense<0.000000e+00> : vector<128xf32>
      %93 = vector.multi_reduction <add>, %92, %cst_36 [0] : vector<16x128xf32> to vector<128xf32>
      %94 = vector.shape_cast %93 : vector<128xf32> to vector<1x128xf32>
      %cst_37 = arith.constant 2.000000e+00 : f32
      %95 = vector.broadcast %cst_37 : f32 to vector<1x128xf32>
      %96 = arith.mulf %95, %83 : vector<1x128xf32>
      %97 = arith.mulf %96, %83 : vector<1x128xf32>
      %98 = arith.subf %94, %97 : vector<1x128xf32>
      %99 = arith.mulf %82, %82 : vector<16x128xf32>
      %cst_38 = arith.constant dense<0.000000e+00> : vector<128xf32>
      %100 = vector.multi_reduction <add>, %99, %cst_38 [0] : vector<16x128xf32> to vector<128xf32>
      %101 = vector.shape_cast %100 : vector<128xf32> to vector<1x128xf32>
      %cst_39 = arith.constant 2.000000e+00 : f32
      %102 = vector.broadcast %cst_39 : f32 to vector<1x128xf32>
      %103 = arith.mulf %102, %84 : vector<1x128xf32>
      %104 = arith.mulf %103, %84 : vector<1x128xf32>
      %105 = arith.subf %101, %104 : vector<1x128xf32>
      %106 = arith.mulf %98, %105 : vector<1x128xf32>
      %107 = math.absf %106 : vector<1x128xf32>
      %cst_40 = arith.constant 9.99999971E-10 : f32
      %108 = vector.broadcast %cst_40 : f32 to vector<1x128xf32>
      %109 = arith.maximumf %107, %108 : vector<1x128xf32>
      %110 = arith.mulf %91, %91 : vector<1x128xf32>
      %111 = arith.divf %110, %109 : vector<1x128xf32>
      %cst_41 = arith.constant 1.000000e+00 : f32
      %112 = vector.broadcast %cst_41 : f32 to vector<1x128xf32>
      %113 = arith.subf %112, %111 : vector<1x128xf32>
      %cst_42 = arith.constant 1.000000e+01 : f32
      %114 = vector.broadcast %cst_42 : f32 to vector<1x128xf32>
      %115 = arith.minimumf %113, %114 : vector<1x128xf32>
      %cst_43 = arith.constant 1.000000e+00 : f32
      %116 = vector.broadcast %cst_43 : f32 to vector<1x128xf32>
      %117 = arith.subf %116, %115 : vector<1x128xf32>
      %cst_44 = arith.constant 0.000000e+00 : f32
      %118 = vector.broadcast %cst_44 : f32 to vector<1x128xf32>
      %119 = arith.maximumf %117, %118 : vector<1x128xf32>
      %c0_45 = arith.constant 0 : index
      %c0_46 = arith.constant 0 : index
      %120 = vector.load %arg8[%c0_45, %c0_46] : memref<1x128xf32, #tpu.memory_space<vmem>>, vector<1x128xf32>
      %121 = arith.addf %120, %119 : vector<1x128xf32>
      %c0_47 = arith.constant 0 : index
      %c0_48 = arith.constant 0 : index
      %122 = vector.load %arg8[%c0_47, %c0_48] : memref<1x128xf32, #tpu.memory_space<vmem>>, vector<1x128xf32>
      tpu.vector_store %arg8[%c0_47, %c0_48], %121 {strides = array<i32>} : memref<1x128xf32, #tpu.memory_space<vmem>>, vector<1x128xf32>,
    } else {
    }
    %c0_4 = arith.constant 0 : index
    %c0_5 = arith.constant 0 : index
    %9 = vector.load %arg4[%c0_4, %c0_5] : memref<2x128xi32, #tpu.memory_space<vmem>>, vector<1x128xi32>
    %c1 = arith.constant 1 : index
    %c0_6 = arith.constant 0 : index
    %10 = vector.load %arg4[%c1, %c0_6] : memref<2x128xi32, #tpu.memory_space<vmem>>, vector<1x128xi32>
    %11 = vector.broadcast %0 : i32 to vector<1x128xi32>
    %12 = arith.cmpi slt, %9, %11 : vector<1x128xi32>
    %13 = vector.broadcast %0 : i32 to vector<1x128xi32>
    %14 = arith.cmpi slt, %10, %13 : vector<1x128xi32>
    %15 = arith.andi %12, %14 : vector<1x128xi1>
    %16 = arith.extui %15 : vector<1x128xi1> to vector<1x128xi32>
    %17 = arith.sitofp %16 : vector<1x128xi32> to vector<1x128xf32>
    %18 = tpu.iota {dimensions = array<i32: 0>} : vector<64x256xi32>
    %19 = tpu.concatenate %9, %10 in 1 : vector<1x128xi32>, vector<1x128xi32> -> vector<1x256xi32>
    %20 = vector.broadcast %19 : vector<1x256xi32> to vector<64x256xi32>
    %21 = arith.cmpi eq, %18, %20 : vector<64x256xi32>
    %22 = arith.extui %21 : vector<64x256xi1> to vector<64x256xi32>
    %23 = arith.sitofp %22 : vector<64x256xi32> to vector<64x256xf32>
    %c0_7 = arith.constant 0 : index
    %c0_8 = arith.constant 0 : index
    %24 = vector.load %arg3[%c0_7, %c0_8] : memref<16x64xf32, #tpu.memory_space<vmem>>, vector<16x64xf32>
    %cst = arith.constant dense<0.000000e+00> : vector<16x256xf32>
    %25 = tpu.matmul %24, %23, %cst {dimension_numbers = #tpu.dot_dimension_numbers<[1], [0], [0], [1], [0, 0, 1, 1], [], []>} : vector<16x64xf32>, vector<64x256xf32>, vector<16x256xf32> -> vector<16x256xf32>
    %26 = vector.extract_strided_slice %25 {offsets = [0, 0], sizes = [16, 128], strides = [1, 1]} : vector<16x256xf32> to vector<16x128xf32>
    %27 = vector.extract_strided_slice %25 {offsets = [0, 128], sizes = [16, 128], strides = [1, 1]} : vector<16x256xf32> to vector<16x128xf32>
    %28 = vector.extract_strided_slice %26 {offsets = [15, 0], sizes = [1, 128], strides = [1, 1]} : vector<16x128xf32> to vector<1x128xf32>
    %29 = vector.extract_strided_slice %27 {offsets = [15, 0], sizes = [1, 128], strides = [1, 1]} : vector<16x128xf32> to vector<1x128xf32>
    %30 = arith.mulf %26, %27 : vector<16x128xf32>
    %cst_9 = arith.constant dense<0.000000e+00> : vector<128xf32>
    %31 = vector.multi_reduction <add>, %30, %cst_9 [0] : vector<16x128xf32> to vector<128xf32>
    %32 = vector.shape_cast %31 : vector<128xf32> to vector<1x128xf32>
    %cst_10 = arith.constant 2.000000e+00 : f32
    %33 = vector.broadcast %cst_10 : f32 to vector<1x128xf32>
    %34 = arith.mulf %33, %28 : vector<1x128xf32>
    %35 = arith.mulf %34, %29 : vector<1x128xf32>
    %36 = arith.subf %32, %35 : vector<1x128xf32>
    %37 = arith.mulf %26, %26 : vector<16x128xf32>
    %cst_11 = arith.constant dense<0.000000e+00> : vector<128xf32>
    %38 = vector.multi_reduction <add>, %37, %cst_11 [0] : vector<16x128xf32> to vector<128xf32>
    %39 = vector.shape_cast %38 : vector<128xf32> to vector<1x128xf32>
    %cst_12 = arith.constant 2.000000e+00 : f32
    %40 = vector.broadcast %cst_12 : f32 to vector<1x128xf32>
    %41 = arith.mulf %40, %28 : vector<1x128xf32>
    %42 = arith.mulf %41, %28 : vector<1x128xf32>
    %43 = arith.subf %39, %42 : vector<1x128xf32>
    %44 = arith.mulf %27, %27 : vector<16x128xf32>
    %cst_13 = arith.constant dense<0.000000e+00> : vector<128xf32>
    %45 = vector.multi_reduction <add>, %44, %cst_13 [0] : vector<16x128xf32> to vector<128xf32>
    %46 = vector.shape_cast %45 : vector<128xf32> to vector<1x128xf32>
    %cst_14 = arith.constant 2.000000e+00 : f32
    %47 = vector.broadcast %cst_14 : f32 to vector<1x128xf32>
    %48 = arith.mulf %47, %29 : vector<1x128xf32>
    %49 = arith.mulf %48, %29 : vector<1x128xf32>
    %50 = arith.subf %46, %49 : vector<1x128xf32>
    %51 = arith.mulf %43, %50 : vector<1x128xf32>
    %52 = math.absf %51 : vector<1x128xf32>
    %cst_15 = arith.constant 9.99999971E-10 : f32
    %53 = vector.broadcast %cst_15 : f32 to vector<1x128xf32>
    %54 = arith.maximumf %52, %53 : vector<1x128xf32>
    %55 = arith.mulf %36, %36 : vector<1x128xf32>
    %56 = arith.divf %55, %54 : vector<1x128xf32>
    %cst_16 = arith.constant 1.000000e+00 : f32
    %57 = vector.broadcast %cst_16 : f32 to vector<1x128xf32>
    %58 = arith.subf %57, %56 : vector<1x128xf32>
    %cst_17 = arith.constant 1.000000e+01 : f32
    %59 = vector.broadcast %cst_17 : f32 to vector<1x128xf32>
    %60 = arith.minimumf %58, %59 : vector<1x128xf32>
    %61 = arith.mulf %60, %17 : vector<1x128xf32>
    %c0_18 = arith.constant 0 : index
    %c0_19 = arith.constant 0 : index
    %62 = vector.load %arg7[%c0_18, %c0_19] : memref<1x128xf32, #tpu.memory_space<vmem>>, vector<1x128xf32>
    %c0_20 = arith.constant 0 : index
    %c0_21 = arith.constant 0 : index
    %63 = vector.load %arg9[%c0_20, %c0_21] : memref<1x128xf32, #tpu.memory_space<vmem>>, vector<1x128xf32>
    %64 = arith.addf %62, %61 : vector<1x128xf32>
    %65 = arith.addf %63, %17 : vector<1x128xf32>
    %c0_22 = arith.constant 0 : index
    %c0_23 = arith.constant 0 : index
    %66 = vector.load %arg7[%c0_22, %c0_23] : memref<1x128xf32, #tpu.memory_space<vmem>>, vector<1x128xf32>
    tpu.vector_store %arg7[%c0_22, %c0_23], %64 {strides = array<i32>} : memref<1x128xf32, #tpu.memory_space<vmem>>, vector<1x128xf32>,
    %c0_24 = arith.constant 0 : index
    %c0_25 = arith.constant 0 : index
    %67 = vector.load %arg9[%c0_24, %c0_25] : memref<1x128xf32, #tpu.memory_space<vmem>>, vector<1x128xf32>
    tpu.vector_store %arg9[%c0_24, %c0_25], %65 {strides = array<i32>} : memref<1x128xf32, #tpu.memory_space<vmem>>, vector<1x128xf32>,
    %c1_i32 = arith.constant 1 : i32
    %68 = arith.cmpi eq, %arg1, %c1_i32 : i32
    %69 = arith.extui %68 : i1 to i32
    %c0_i32_26 = arith.constant 0 : i32
    %70 = arith.cmpi ne, %69, %c0_i32_26 : i32
    scf.if %70 {
      %c0_27 = arith.constant 0 : index
      %c0_28 = arith.constant 0 : index
      %71 = vector.load %arg7[%c0_27, %c0_28] : memref<1x128xf32, #tpu.memory_space<vmem>>, vector<1x128xf32>
      %c0_29 = arith.constant 0 : index
      %c0_30 = arith.constant 0 : index
      %c0_31 = arith.constant 0 : index
      %72 = vector.load %arg6[%c0_29, %c0_30, %c0_31] : memref<1x3x128xf32, #tpu.memory_space<vmem>>, vector<1x1x128xf32>
      %73 = vector.shape_cast %72 : vector<1x1x128xf32> to vector<1x128xf32>
      %74 = vector.shape_cast %71 : vector<1x128xf32> to vector<1x1x128xf32>
      tpu.vector_store %arg6[%c0_29, %c0_30, %c0_31], %74 {strides = array<i32>} : memref<1x3x128xf32, #tpu.memory_space<vmem>>, vector<1x1x128xf32>,
      %c0_32 = arith.constant 0 : index
      %c0_33 = arith.constant 0 : index
      %75 = vector.load %arg8[%c0_32, %c0_33] : memref<1x128xf32, #tpu.memory_space<vmem>>, vector<1x128xf32>
      %c0_34 = arith.constant 0 : index
      %c1_35 = arith.constant 1 : index
      %c0_36 = arith.constant 0 : index
      %76 = vector.load %arg6[%c0_34, %c1_35, %c0_36] : memref<1x3x128xf32, #tpu.memory_space<vmem>>, vector<1x1x128xf32>
      %77 = vector.shape_cast %76 : vector<1x1x128xf32> to vector<1x128xf32>
      %78 = vector.shape_cast %75 : vector<1x128xf32> to vector<1x1x128xf32>
      tpu.vector_store %arg6[%c0_34, %c1_35, %c0_36], %78 {strides = array<i32>} : memref<1x3x128xf32, #tpu.memory_space<vmem>>, vector<1x1x128xf32>,
      %c0_37 = arith.constant 0 : index
      %c0_38 = arith.constant 0 : index
      %79 = vector.load %arg9[%c0_37, %c0_38] : memref<1x128xf32, #tpu.memory_space<vmem>>, vector<1x128xf32>
      %c0_39 = arith.constant 0 : index
      %c2 = arith.constant 2 : index
      %c0_40 = arith.constant 0 : index
      %80 = vector.load %arg6[%c0_39, %c2, %c0_40] : memref<1x3x128xf32, #tpu.memory_space<vmem>>, vector<1x1x128xf32>
      %81 = vector.shape_cast %80 : vector<1x1x128xf32> to vector<1x128xf32>
      %82 = vector.shape_cast %79 : vector<1x128xf32> to vector<1x1x128xf32>
      tpu.vector_store %arg6[%c0_39, %c2, %c0_40], %82 {strides = array<i32>} : memref<1x3x128xf32, #tpu.memory_space<vmem>>, vector<1x1x128xf32>,
    } else {
    }
    return
  }
  func.func @transform_0(%arg0: i32, %arg1: i32, %arg2: memref<1xi32, #tpu.memory_space<smem>>) -> (i32, i32) {
    %c0_i32 = arith.constant 0 : i32
    %c0_i32_0 = arith.constant 0 : i32
    %c0_i32_1 = arith.constant 0 : i32
    return %c0_i32, %c0_i32_0 : i32, i32
  }
  func.func @transform_1(%arg0: i32, %arg1: i32, %arg2: memref<1xi32, #tpu.memory_space<smem>>) -> (i32, i32) {
    %c2_i32 = arith.constant 2 : i32
    %0 = arith.muli %arg0, %c2_i32 : i32
    %1 = arith.addi %0, %arg1 : i32
    %c0_i32 = arith.constant 0 : i32
    %c0_i32_0 = arith.constant 0 : i32
    return %c0_i32, %1 : i32, i32
  }
  func.func @transform_2(%arg0: i32, %arg1: i32, %arg2: memref<1xi32, #tpu.memory_space<smem>>) -> (i32, i32) {
    %c0_i32 = arith.constant 0 : i32
    %c0_i32_0 = arith.constant 0 : i32
    %c0_i32_1 = arith.constant 0 : i32
    return %c0_i32, %c0_i32_0 : i32, i32
  }
  func.func @transform_3(%arg0: i32, %arg1: i32, %arg2: memref<1xi32, #tpu.memory_space<smem>>) -> (i32, i32, i32) {
    %c0_i32 = arith.constant 0 : i32
    %c0_i32_0 = arith.constant 0 : i32
    %c0_i32_1 = arith.constant 0 : i32
    return %arg0, %c0_i32, %c0_i32_0 : i32, i32, i32
  }
}

</mosaic_0001>

<bundles_post_ra>
// kernel: tpu_custom_call.1
= control target key start
LH: loop header
LB: loop body
LE: loop exit
PB: predicated region body
PF: predicated region fallthrough
CT: control target
= control target key end

     0   :  { %s1297_s0 = inlined_call_operand.<no memory space> [shape: s32[1], index: 0, kind: input, shape index: {}]   ;;  %s1298_s1 = inlined_call_operand.hbm [shape: f32[16,64], index: 1, kind: input, shape index: {}]   ;;  %s1299_s2 = inlined_call_operand.hbm [shape: s32[2,512], index: 2, kind: input, shape index: {}]   ;;  %s1300_s3 = inlined_call_operand.vmem [shape: s32[2,128], index: 3, kind: input, shape index: {}]   ;;  %s1301_s4 = inlined_call_operand.vmem [shape: f32[2,3,128], index: 4, kind: output, shape index: {}]  }
   0x1   :  { %1302 = sst [smem:[#allocation13_spill]] %s1298_s1 }
   0x2   :  { %9 = sst [smem:[#allocation6]] %s1297_s0 }
   0x3   :  { %10 = vsyncpa [#allocation8], 0 }
   0x4   :  { %11 = vsyncpa [#allocation10], 0 }
   0x5   :  { %13 = vsyncpa [#allocation10 + $0x1], 0  ;;  %s1105_s17 = smov 0   ;;  %s1107_s18 = smov 0  }
   0x6   :  { %s1109_s19 = smov 0   ;;  %s1111_s20 = smov 0  }
   0x7   :  { %s1113_s21 = smov 0   ;;  %s1115_s22 = smov 0  }
   0x8   :  { %s1117_s23 = smov 0   ;;  %s1119_s24 = smov 0  }
   0x9 LB: > { %s740_s0 = sadd.s32 4294967295, %s1064_s24   ;;  %p76_p0 = scmp.ne.s32.totalorder %s1040_s18, %s1036_s17  ;;  %s1064_s24 = sphi %s1119_s24, %s19_s24   ;;  %s1060_s23 = sphi %s1117_s23, %s1314_s23   ;;  %s1056_s22 = sphi %s1115_s22, %s1313_s22   ;;  %s1052_s21 = sphi %s1113_s21, %s1312_s21   ;;  %s1048_s20 = sphi %s1111_s20, %s1311_s20   ;;  %s1044_s19 = sphi %s1109_s19, %s1310_s19   ;;  %s1040_s18 = sphi %s1107_s18, %s1309_s18   ;;  %s1036_s17 = sphi %s1105_s17, %s1308_s17  }
   0xa   : > { %p1145_p1 = scmp.eq.s32.totalorder %s740_s0, 0  ;;  %p744_p2 = scmp.ge.s32.totalorder %s1064_s24, 1 }
   0xb   : > { %p134_p3 = scmp.lt.s32.totalorder %s1064_s24, 5  ;;  %s1066_s28 = smov [#allocation7]  }
   0xc   : > { %p1153_p4 = por %p1145_p1, %p76_p0  ;;  %s146_s29 = sshll.u32 %s1066_s28, 4  ;;  %s147_s29 = int_to_ptr.vmem [resolvable:$true] %s146_s29 }
   0xd   : > { %p1157_p5 = pnand %p744_p2, %p134_p3  ;;  %s951_s30 = scalar_lea.vmem %s147_s29, 256 }
   0xe   : > { %p952_p9 = scmp.ne.s32.totalorder %s147_s29, %s951_s30  ;;  %p959_p12 = scmp.lt.s32.totalorder %s147_s29, %s147_s29 }
   0xf   : > { %p851_p6 = pneg %p1157_p5  ;;  %p960_p13 = scmp.lt.s32.totalorder %s951_s30, %s951_s30 }
  0x11   : > { %p852_p7 = pnand %p851_p6, %p1145_p1  ;;  %p961_p0 = por %p960_p13, %p959_p12 }
  0x13   : > { %p942_p8 = pneg %p852_p7 }
  0x15   : > { %p954_p10 = pnand %p952_p9, %p942_p8 }
  0x17   : > { %p955_p11 = pneg %p954_p10 }
  0x19   : > { %p962_p2 = pnand %p961_p0, %p955_p11 }
  0x1b   : > { %965 = shalt.err (!%p962_p2)
}
  0x1c   : > { %s1067_s5 = smov 128   ;;  %s1068_s6 = smov 8  }
  0x1d   : > { %s1306_s1 = sld [smem:[#allocation13_spill]]  ;;  %s28_s9 = sadd.s32 1, %s1056_s22 }
  0x1e   : > { %p29_p3 = scmp.ge.s32.totalorder %s28_s9, 2  ;;  %s31_s10 = sadd.s32 1, %s1060_s23 }
  0x1f   : > { %s742_s11 = sshll.u32 %s1060_s23, 1  ;;  %s63_s12 = sadd.s32 1, %s1044_s19 }
  0x20   : > { %s1316_s9 = smov (%p29_p3, %s28_s9), 0  ;;  %s1318_s10 = smov (!%p29_p3, %s31_s10), %s1060_s23 }
  0x21   : > { %s57_s13 = sadd.s32 %s1056_s22, %s742_s11  ;;  %p70_p6 = scmp.ne.s32.totalorder %s1044_s19, %s1040_s18 }
  0x22   : > { %p33_p8 = scmp.ge.s32.totalorder %s1318_s10, 2  ;;  %p71_p9 = scmp.eq.s32.totalorder %s1064_s24, 0 }
  0x23   : > { %854 = dma.hbm_to_vmem [thread:$0]  (!%p852_p7), %s1306_s1, 256, %s147_s29, [#allocation8], %s1067_s5, %s1067_s5, %s1068_s6  }
  0x24   : > { %p860_p10 = scmp.lt.s32.totalorder %s1064_s24, 4  ;;  %s163_s14 = sand.u32 1, %s1044_s19  }
  0x25   : > { %s1320_s10 = smov (%p33_p8, %s1318_s10), 0  ;;  %p72_p7 = por %p71_p9, %p70_p6 }
  0x26   : > { %s743_s15 = sshll.u32 %s1320_s10, 1  ;;  %s747_s16 = sshll.u32 %s163_s14, 1 }
  0x27   : > { %s59_s17 = sadd.s32 %s743_s15, %s1316_s9  ;;  %s749_s28 = sshll.u32 %s57_s13, 5 }
  0x28   : > { %s60_s0 = ssub.s32 %s57_s13, %s59_s17  ;;  %s174_s5 = scalar_lea.hbm %s1299_s2, %s749_s28 }
  0x29   : > { %p61_p11 = scmp.eq.s32.totalorder %s60_s0, 0  ;;  %s167_s6 = scalar_lea.vmem [#allocation9], %s747_s16 }
  0x2a   : > { %s176_s7 = sshll.u32 %s167_s6, 4  ;;  %p1190_p12 = pnand %p860_p10, %p72_p7  ;;  %s177_s7 = int_to_ptr.vmem [resolvable:$true] %s176_s7 }
  0x2b   : > { %s1195_s11 = scalar_select %p61_p11, %s1044_s19, %s63_s12  }
  0x2c   : > { %s164_s1 = scalar_lea.sflag [#allocation10], %s163_s14  ;;  %p968_p13 = pneg %p1190_p12 }
  0x2d   : > { %s979_s13 = scalar_lea.vmem %s177_s7, 32  ;;  %s1069_s15 = smov [#allocation9]  }
  0x2e   : > { %p980_p0 = scmp.ne.s32.totalorder %s177_s7, %s979_s13  ;;  %s984_s17 = sshll.u32 %s1069_s15, 4  ;;  %s985_s17 = int_to_ptr.vmem [resolvable:$false] %s984_s17 }
  0x2f   : > { %s986_s16 = scalar_lea.vmem %s985_s17, 64  ;;  %p987_p6 = scmp.lt.s32.totalorder %s177_s7, %s985_s17 }
  0x30   : > { %p982_p2 = pnand %p980_p0, %p968_p13  ;;  %p988_p8 = scmp.lt.s32.totalorder %s986_s16, %s979_s13 }
  0x32   : > { %p983_p3 = pneg %p982_p2  ;;  %p989_p9 = por %p988_p8, %p987_p6 }
  0x34   : > { %p990_p10 = pnand %p989_p9, %p983_p3 }
  0x36   : > { %993 = shalt.err (!%p990_p10)
}
  0x37   : > { %858 = dma.hbm_to_vmem [thread:$0]  (!%p1190_p12), %s174_s5, 32, %s177_s7, %s164_s1  }
  0x38   : > { %185 = sbr.rel (%p1157_p5) target bundleno = 656 (0x290), region = 32 }
  0x3d   : > { %1027 = dma.done.wait (%p1145_p1), [#allocation8], 256  }
  0x3e   : > { %1029 = vsyncadd (%p1145_p1), [#allocation8], 4294967040  ;;  %s191_s12 = sand.u32 1, %s1040_s18  }
  0x3f   : > { %s1208_s14 = sshll.u32 %s191_s12, 1  ;;  %s192_s0 = scalar_lea.sflag [#allocation10], %s191_s12 }
  0x40   : > { %s195_s28 = scalar_lea.vmem [#allocation9], %s1208_s14 }
  0x41   : > { %1031 = dma.done.wait (%p1153_p4), %s192_s0, 32  }
  0x42   : > { %1033 = vsyncadd (%p1153_p4), %s192_s0, 4294967264  ;;  %p219_p5 = scmp.lt.s32.totalorder %s1052_s21, 1  ;;  %p225_p7 = scmp.eq.s32.totalorder %s1048_s20, 0 }
  0x43   : > { %s1217_s1 = sld [smem:[#allocation6]]  ;;  %p754_p1 = scmp.ne.s32.totalorder %s1048_s20, 0 }
  0x44   : > { %s220_s25 = scalar_select %p219_p5, %s1052_s21, 1 }
  0x45   : > { %228 = sbr.rel (%p754_p1) target bundleno = 77 (0x4d), region = 44 }
  0x46   : > { %s753_s27 = sshll.u32 %s220_s25, 2 }
  0x47   : > { %s1223_s5 = scalar_lea.vmem %s1301_s4, %s753_s27 }
  0x4a   : > { %v1070_v0 = vmov 0.0  }
  0x4b   : > { %229 = vst [vmem:[#allocation2] sm:$0x1] %v1070_v0  ;;  %230 = vst [vmem:[#allocation3] sm:$0x1] %v1070_v0 }
  0x4c   : > { %231 = vst [vmem:[#allocation4] sm:$0x1] %v1070_v0 }
  0x4d PF: > { %p232_p4 = scmp.eq.s32.totalorder %s1052_s21, 0 }
  0x4f   : > { %p233_p11 = pnand %p232_p4, %p225_p7 }
  0x51   : > { %236 = sbr.rel (%p233_p11) target bundleno = 367 (0x16f), region = 48 }
  0x56   : > { %v239_v1 = vlaneseq  ;;  %v1071_v3 = vmov 0.0   ;;  %v756_v4 = vld [vmem:[%s1300_s3 + $0x1] ss:$0 sm:$0xff]  ;;  %v755_v5 = vld [vmem:[%s1300_s3] ss:$0 sm:$0xff]  ;;  %v312_v14 = vld [vmem:[#allocation7] sm:$0xff] }
  0x57   : > { %353 = vmatprep.mubr.f32.mxu0 %v1071_v3  ;;  %359 = vmatprep.mubr.f32.mxu1 %v1071_v3  ;;  %v1072_v12 = vmov 1.0|1.0   ;;  %v313_v15 = vld [vmem:[#allocation7 + $0x8] sm:$0xff]  ;;  %v1073_v61 = vmov 1966171168  }
  0x58   : > { %v1229_v2 = vshrl.u32 %v239_v1, 7  ;;  %v415_v62 = vunpack.c.l.s4 %v1073_v61 }
  0x5a   : > { %v246_v6 = vadd.s32 48, %v1229_v2  ;;  %v247_v7 = vadd.s32 56, %v1229_v2  ;;  %v244_v8 = vadd.s32 32, %v1229_v2  ;;  %v245_v9 = vadd.s32 40, %v1229_v2 }
  0x5b   : > { %v242_v10 = vadd.s32 16, %v1229_v2  ;;  %v243_v11 = vadd.s32 24, %v1229_v2  ;;  %v241_v13 = vadd.s32 8, %v1229_v2  ;;  %v416_v1 = vunpack.c.0.s8 %v415_v62 }
  0x5c   : > { %vm269_vm0 = vcmp.eq.s32.totalorder %v246_v6, %v756_v4  ;;  %vm271_vm1 = vcmp.eq.s32.totalorder %v247_v7, %v756_v4  ;;  %vm268_vm2 = vcmp.eq.s32.totalorder %v246_v6, %v755_v5  ;;  %vm270_vm3 = vcmp.eq.s32.totalorder %v247_v7, %v755_v5 }
  0x5d   : > { %vm773_vm4 = vmpackc.low %vm271_vm1, %vm269_vm0  ;;  %vm265_vm5 = vcmp.eq.s32.totalorder %v244_v8, %v756_v4  ;;  %vm267_vm6 = vcmp.eq.s32.totalorder %v245_v9, %v756_v4  ;;  %vm264_vm7 = vcmp.eq.s32.totalorder %v244_v8, %v755_v5  ;;  %vm266_vm8 = vcmp.eq.s32.totalorder %v245_v9, %v755_v5 }
  0x5e   : > { %774 = vmatprep.subr.msk.bf16.mxu0 %vm773_vm4, %v1072_v12  ;;  %829 = vmatprep.subr.msk.bf16.mxu1 %vm773_vm4, %v1072_v12  ;;  %vm775_vm9 = vmpackc.low %vm270_vm3, %vm268_vm2  ;;  %vm261_vm10 = vcmp.eq.s32.totalorder %v242_v10, %v756_v4  ;;  %vm263_vm11 = vcmp.eq.s32.totalorder %v243_v11, %v756_v4  ;;  %vm260_vm15 = vcmp.eq.s32.totalorder %v242_v10, %v755_v5  ;;  %v411_v10 = vld [vmem:[#allocation3] sm:$0x1] }
  0x5f   : > { %776 = vmatpush1.bf16.msk.msra.mxu0 %vm775_vm9, %v1072_v12  ;;  %833 = vmatpush1.bf16.msk.msra.mxu1 %vm775_vm9, %v1072_v12  ;;  %vm777_vm12 = vmpackc.low %vm267_vm6, %vm265_vm5  ;;  %vm262_vm0 = vcmp.eq.s32.totalorder %v243_v11, %v755_v5  ;;  %vm257_vm1 = vcmp.eq.s32.totalorder %v1229_v2, %v756_v4  ;;  %vm259_vm4 = vcmp.eq.s32.totalorder %v241_v13, %v756_v4 }
  0x60   : > { %778 = vmatprep.subr.msk.bf16.mxu0 %vm777_vm12, %v1072_v12  ;;  %830 = vmatprep.subr.msk.bf16.mxu1 %vm777_vm12, %v1072_v12  ;;  %vm779_vm13 = vmpackc.low %vm266_vm8, %vm264_vm7  ;;  %vm256_vm9 = vcmp.eq.s32.totalorder %v1229_v2, %v755_v5  ;;  %vm258_vm5 = vcmp.eq.s32.totalorder %v241_v13, %v755_v5  ;;  %vm314_vm7 = vcmask 523264   ;;  %v419_v5 = vsub.s32 %v416_v1, %v1229_v2 }
  0x61   : > { %vm781_vm14 = vmpackc.low %vm263_vm11, %vm261_vm10 }
  0x62   : > { %vm783_vm2 = vmpackc.low %vm262_vm0, %vm260_vm15 }
  0x63   : > { %780 = vmatpush1.bf16.msk.msra.mxu0 %vm779_vm13, %v1072_v12  ;;  %834 = vmatpush1.bf16.msk.msra.mxu1 %vm779_vm13, %v1072_v12  ;;  %vm785_vm3 = vmpackc.low %vm259_vm4, %vm257_vm1 }
  0x64   : > { %782 = vmatprep.subr.msk.bf16.mxu0 %vm781_vm14, %v1072_v12  ;;  %831 = vmatprep.subr.msk.bf16.mxu1 %vm781_vm14, %v1072_v12  ;;  %vm787_vm6 = vmpackc.low %vm258_vm5, %vm256_vm9 }
  0x67   : > { %784 = vmatpush1.bf16.msk.msra.mxu0 %vm783_vm2, %v1072_v12  ;;  %835 = vmatpush1.bf16.msk.msra.mxu1 %vm783_vm2, %v1072_v12 }
  0x68   : > { %786 = vmatprep.subr.msk.bf16.mxu0 %vm785_vm3, %v1072_v12  ;;  %832 = vmatprep.subr.msk.bf16.mxu1 %vm785_vm3, %v1072_v12 }
  0x6b   : > { %788 = vmatpush1.bf16.msk.msra.mxu0 %vm787_vm6, %v1072_v12  ;;  %836 = vmatpush1.bf16.msk.msra.mxu1 %vm787_vm6, %v1072_v12 }
  0x6e   : > { %789 = vmatmul.mubr.msk.f32.vlgmr.msra.gmra.mxu0 %vm314_vm7, %v312_v14  ;;  %790 = vmatmul.mubr.msk.f32.vlgmr.msra.gmra.mxu1 %vm314_vm7, %v313_v15 }
 0x12e   : > { %v355_v16 = vpop.f32.mrf.mxu0  ;;  %v361_v17 = vpop.f32.mrf.mxu1 }
 0x12f   : > { %v378_v18 = vmul.f32 %v355_v16, %v355_v16  ;;  %v379_v19 = vmul.f32 %v361_v17, %v361_v17  ;;  %v375_v38 = vmul.f32 2.0, %v361_v17 }
 0x130   : > { %v357_v20 = vpop.f32.mrf.mxu0  ;;  %v363_v21 = vpop.f32.mrf.mxu1 }
 0x131   : > { %v380_v22 = vadd.f32 %v379_v19, %v378_v18  ;;  %v389_v23 = vmul.f32 %v357_v20, %v357_v20  ;;  %v366_v24 = vmul.f32 %v357_v20, %v355_v16  ;;  %v367_v25 = vmul.f32 %v363_v21, %v361_v17 }
 0x132   : > { %v390_v26 = vmul.f32 %v363_v21, %v363_v21  ;;  %v398_v40 = vmul.f32 2.0, %v363_v21  ;;  %v387_v44 = vmul.f32 %v375_v38, %v361_v17  ;;  %v376_v56 = vmul.f32 %v375_v38, %v363_v21 }
 0x133   : > { %v381_v27 = vrot.slane %v380_v22, 4  ;;  %v368_v30 = vadd.f32 %v367_v25, %v366_v24 }
 0x134   : > { %v391_v28 = vadd.f32 %v390_v26, %v389_v23  ;;  %v399_v46 = vmul.f32 %v398_v40, %v363_v21 }
 0x135   : > { %v382_v29 = vadd.f32 %v381_v27, %v380_v22  ;;  %v369_v35 = vrot.slane %v368_v30, 4 }
 0x136   : > { %v392_v31 = vrot.slane %v391_v28, 4 }
 0x137   : > { %v383_v32 = vrot.slane %v382_v29, 2  ;;  %v370_v42 = vadd.f32 %v369_v35, %v368_v30 }
 0x138   : > { %v393_v33 = vadd.f32 %v392_v31, %v391_v28 }
 0x139   : > { %v384_v34 = vadd.f32 %v383_v32, %v382_v29  ;;  %v371_v48 = vrot.slane %v370_v42, 2 }
 0x13a   : > { %v394_v36 = vrot.slane %v393_v33, 2 }
 0x13b   : > { %v385_v37 = vrot.slane %v384_v34, 1  ;;  %v372_v51 = vadd.f32 %v371_v48, %v370_v42 }
 0x13c   : > { %v395_v39 = vadd.f32 %v394_v36, %v393_v33 }
 0x13d   : > { %v386_v41 = vadd.f32 %v385_v37, %v384_v34  ;;  %v373_v54 = vrot.slane %v372_v51, 1 }
 0x13e   : > { %v396_v43 = vrot.slane %v395_v39, 1 }
 0x13f   : > { %v388_v47 = vsub.f32 %v386_v41, %v387_v44  ;;  %v374_v55 = vadd.f32 %v373_v54, %v372_v51 }
 0x140   : > { %v397_v45 = vadd.f32 %v396_v43, %v395_v39 }
 0x141   : > { %v377_v57 = vsub.f32 %v374_v55, %v376_v56 }
 0x142   : > { %v400_v49 = vsub.f32 %v397_v45, %v399_v46 }
 0x143   : > { %v404_v58 = vmul.f32 %v377_v57, %v377_v57 }
 0x144   : > { %v401_v50 = vmul.f32 %v400_v49, %v388_v47 }
 0x146   : > { %v402_v52 = vand.u32 2147483647, %v401_v50 }
 0x148   : > { %v403_v53 = vmax.f32 %v402_v52, 1e-09 }
 0x14a   : > { %936 = vrcp.f32 %v403_v53 }
 0x157   : > { %v937_v59 = vpop.eup %936 }
 0x158   : > { %v406_v60 = vmul.f32 %v937_v59, %v404_v58 }
 0x15a   : > { %v407_v63 = vsub.f32 1.0, %v406_v60 }
 0x15c   : > { %v408_v0 = vmin.f32 %v407_v63, 10.0 }
 0x15e   : > { %v409_v3 = vsub.f32 1.0, %v408_v0 }
 0x160   : > { %v410_v4 = vmax.f32 %v409_v3, 0.0 }
 0x162   : > { %v413_v6 = vcombine.high %v410_v4, %v410_v4 }
 0x164   : > { %v420_v7 = vrot.slane %v413_v6, %v419_v5 }
 0x166   : > { %v421_v8 = vcombine.high %v420_v7, %v420_v7 }
 0x168   : > { %v428_v9 = vrot.slane %v421_v8, %v419_v5 }
 0x16a   : > { %v429_v11 = vcombine.high %v428_v9, %v428_v9 }
 0x16c   : > { %v431_v12 = vadd.f32 %v429_v11, %v411_v10 }
 0x16e   : > { %432 = vst [vmem:[#allocation3] sm:$0x1] %v431_v12 }
 0x16f PF: > { %v434_v13 = vld [vmem:[%s195_s28 + $0x1] sm:$0x1]  ;;  %v441_v14 = vlaneseq  ;;  %v433_v15 = vld [vmem:[%s195_s28] sm:$0x1]  ;;  %v435_v16 = vstv %s1217_s1  ;;  %v1074_v17 = vmov 0.0   ;;  %v514_v32 = vld [vmem:[#allocation7] sm:$0xff] }
 0x170   : > { %vm436_vm8 = vcmp.lt.s32.totalorder %v433_v15, %v435_v16  ;;  %vm437_vm10 = vcmp.lt.s32.totalorder %v434_v13, %v435_v16  ;;  %555 = vmatprep.mubr.f32.mxu0 %v1074_v17  ;;  %561 = vmatprep.mubr.f32.mxu1 %v1074_v17  ;;  %v616_v18 = vld [vmem:[#allocation4] sm:$0x1]  ;;  %v1075_v30 = vmov 1.0|1.0   ;;  %v515_v33 = vld [vmem:[#allocation7 + $0x8] sm:$0xff]  ;;  %p826_p12 = scmp.ne.s32.totalorder %s1048_s20, 1 }
 0x171   : > { %v1252_v2 = vshrl.u32 %v441_v14, 7  ;;  %vm438_vm11 = vmand %vm436_vm8, %vm437_vm10  ;;  %v1076_v14 = vmov 1966171168  }
 0x172   : > { %v1260_v25 = vsel %vm438_vm11, 1.0, %v1074_v17 }
 0x173   : > { %v448_v19 = vadd.s32 48, %v1252_v2  ;;  %v449_v20 = vadd.s32 56, %v1252_v2  ;;  %v452_v21 = vsub.s32 0, %v1252_v2  ;;  %v446_v22 = vadd.s32 32, %v1252_v2 }
 0x174   : > { %v447_v23 = vadd.s32 40, %v1252_v2  ;;  %v444_v24 = vadd.s32 16, %v1252_v2  ;;  %v445_v28 = vadd.s32 24, %v1252_v2  ;;  %v637_v29 = vadd.f32 %v1260_v25, %v616_v18 }
 0x175   : > { %v457_v26 = vrot.slane %v434_v13, %v452_v21  ;;  %v453_v27 = vrot.slane %v433_v15, %v452_v21  ;;  %v443_v31 = vadd.s32 8, %v1252_v2  ;;  %v620_v15 = vunpack.c.l.s4 %v1076_v14 }
 0x176   : > { %639 = vst [vmem:[#allocation4] sm:$0x1] %v637_v29  ;;  %v612_v18 = vrot.slane %v1260_v25, 1  ;;  %v615_v29 = vld [vmem:[#allocation2] sm:$0x1] }
 0x177   : > { %vm471_vm12 = vcmp.eq.s32.totalorder %v448_v19, %v457_v26  ;;  %vm473_vm13 = vcmp.eq.s32.totalorder %v449_v20, %v457_v26  ;;  %vm470_vm14 = vcmp.eq.s32.totalorder %v448_v19, %v453_v27  ;;  %vm472_vm15 = vcmp.eq.s32.totalorder %v449_v20, %v453_v27 }
 0x178   : > { %vm808_vm0 = vmpackc.low %vm473_vm13, %vm471_vm12  ;;  %vm467_vm1 = vcmp.eq.s32.totalorder %v446_v22, %v457_v26  ;;  %vm469_vm4 = vcmp.eq.s32.totalorder %v447_v23, %v457_v26  ;;  %vm466_vm2 = vcmp.eq.s32.totalorder %v446_v22, %v453_v27  ;;  %vm468_vm3 = vcmp.eq.s32.totalorder %v447_v23, %v453_v27 }
 0x179   : > { %809 = vmatprep.subr.msk.bf16.mxu0 %vm808_vm0, %v1075_v30  ;;  %837 = vmatprep.subr.msk.bf16.mxu1 %vm808_vm0, %v1075_v30  ;;  %vm810_vm9 = vmpackc.low %vm472_vm15, %vm470_vm14  ;;  %vm463_vm5 = vcmp.eq.s32.totalorder %v444_v24, %v457_v26  ;;  %vm465_vm6 = vcmp.eq.s32.totalorder %v445_v28, %v457_v26  ;;  %vm462_vm11 = vcmp.eq.s32.totalorder %v444_v24, %v453_v27  ;;  %v621_v20 = vunpack.c.0.s8 %v620_v15 }
 0x17a   : > { %811 = vmatpush1.bf16.msk.msra.mxu0 %vm810_vm9, %v1075_v30  ;;  %841 = vmatpush1.bf16.msk.msra.mxu1 %vm810_vm9, %v1075_v30  ;;  %vm812_vm7 = vmpackc.low %vm469_vm4, %vm467_vm1  ;;  %vm464_vm12 = vcmp.eq.s32.totalorder %v445_v28, %v453_v27  ;;  %vm459_vm13 = vcmp.eq.s32.totalorder %v1252_v2, %v457_v26  ;;  %vm461_vm0 = vcmp.eq.s32.totalorder %v443_v31, %v457_v26 }
 0x17b   : > { %813 = vmatprep.subr.msk.bf16.mxu0 %vm812_vm7, %v1075_v30  ;;  %838 = vmatprep.subr.msk.bf16.mxu1 %vm812_vm7, %v1075_v30  ;;  %vm814_vm8 = vmpackc.low %vm468_vm3, %vm466_vm2  ;;  %vm458_vm9 = vcmp.eq.s32.totalorder %v1252_v2, %v453_v27  ;;  %vm460_vm1 = vcmp.eq.s32.totalorder %v443_v31, %v453_v27  ;;  %vm516_vm2 = vcmask 523264   ;;  %v624_v23 = vsub.s32 %v621_v20, %v1252_v2 }
 0x17c   : > { %vm816_vm10 = vmpackc.low %vm465_vm6, %vm463_vm5 }
 0x17d   : > { %vm818_vm14 = vmpackc.low %vm464_vm12, %vm462_vm11 }
 0x17e   : > { %815 = vmatpush1.bf16.msk.msra.mxu0 %vm814_vm8, %v1075_v30  ;;  %842 = vmatpush1.bf16.msk.msra.mxu1 %vm814_vm8, %v1075_v30  ;;  %vm820_vm15 = vmpackc.low %vm461_vm0, %vm459_vm13 }
 0x17f   : > { %817 = vmatprep.subr.msk.bf16.mxu0 %vm816_vm10, %v1075_v30  ;;  %839 = vmatprep.subr.msk.bf16.mxu1 %vm816_vm10, %v1075_v30  ;;  %vm822_vm4 = vmpackc.low %vm460_vm1, %vm458_vm9 }
 0x182   : > { %819 = vmatpush1.bf16.msk.msra.mxu0 %vm818_vm14, %v1075_v30  ;;  %843 = vmatpush1.bf16.msk.msra.mxu1 %vm818_vm14, %v1075_v30 }
 0x183   : > { %821 = vmatprep.subr.msk.bf16.mxu0 %vm820_vm15, %v1075_v30  ;;  %840 = vmatprep.subr.msk.bf16.mxu1 %vm820_vm15, %v1075_v30 }
 0x186   : > { %823 = vmatpush1.bf16.msk.msra.mxu0 %vm822_vm4, %v1075_v30  ;;  %844 = vmatpush1.bf16.msk.msra.mxu1 %vm822_vm4, %v1075_v30 }
 0x189   : > { %824 = vmatmul.mubr.msk.f32.vlgmr.msra.gmra.mxu0 %vm516_vm2, %v514_v32  ;;  %825 = vmatmul.mubr.msk.f32.vlgmr.msra.gmra.mxu1 %vm516_vm2, %v515_v33 }
 0x249   : > { %v557_v34 = vpop.f32.mrf.mxu0  ;;  %v563_v35 = vpop.f32.mrf.mxu1 }
 0x24a   : > { %v580_v36 = vmul.f32 %v557_v34, %v557_v34  ;;  %v581_v37 = vmul.f32 %v563_v35, %v563_v35  ;;  %v577_v56 = vmul.f32 2.0, %v563_v35 }
 0x24b   : > { %v559_v38 = vpop.f32.mrf.mxu0  ;;  %v565_v39 = vpop.f32.mrf.mxu1 }
 0x24c   : > { %v582_v40 = vadd.f32 %v581_v37, %v580_v36  ;;  %v591_v41 = vmul.f32 %v559_v38, %v559_v38  ;;  %v568_v42 = vmul.f32 %v559_v38, %v557_v34  ;;  %v569_v43 = vmul.f32 %v565_v39, %v563_v35 }
 0x24d   : > { %v592_v44 = vmul.f32 %v565_v39, %v565_v39  ;;  %v600_v58 = vmul.f32 2.0, %v565_v39  ;;  %v589_v62 = vmul.f32 %v577_v56, %v563_v35  ;;  %v578_v11 = vmul.f32 %v577_v56, %v565_v39 }
 0x24e   : > { %v583_v45 = vrot.slane %v582_v40, 4  ;;  %v570_v48 = vadd.f32 %v569_v43, %v568_v42 }
 0x24f   : > { %v593_v46 = vadd.f32 %v592_v44, %v591_v41  ;;  %v601_v0 = vmul.f32 %v600_v58, %v565_v39 }
 0x250   : > { %v584_v47 = vadd.f32 %v583_v45, %v582_v40  ;;  %v571_v53 = vrot.slane %v570_v48, 4 }
 0x251   : > { %v594_v49 = vrot.slane %v593_v46, 4 }
 0x252   : > { %v585_v50 = vrot.slane %v584_v47, 2  ;;  %v572_v60 = vadd.f32 %v571_v53, %v570_v48 }
 0x253   : > { %v595_v51 = vadd.f32 %v594_v49, %v593_v46 }
 0x254   : > { %v586_v52 = vadd.f32 %v585_v50, %v584_v47  ;;  %v573_v3 = vrot.slane %v572_v60, 2 }
 0x255   : > { %v596_v54 = vrot.slane %v595_v51, 2 }
 0x256   : > { %v587_v55 = vrot.slane %v586_v52, 1  ;;  %v574_v6 = vadd.f32 %v573_v3, %v572_v60 }
 0x257   : > { %v597_v57 = vadd.f32 %v596_v54, %v595_v51 }
 0x258   : > { %v588_v59 = vadd.f32 %v587_v55, %v586_v52  ;;  %v575_v9 = vrot.slane %v574_v6, 1 }
 0x259   : > { %v598_v61 = vrot.slane %v597_v57, 1 }
 0x25a   : > { %v590_v1 = vsub.f32 %v588_v59, %v589_v62  ;;  %v576_v10 = vadd.f32 %v575_v9, %v574_v6 }
 0x25b   : > { %v599_v63 = vadd.f32 %v598_v61, %v597_v57 }
 0x25c   : > { %v579_v12 = vsub.f32 %v576_v10, %v578_v11 }
 0x25d   : > { %v602_v4 = vsub.f32 %v599_v63, %v601_v0 }
 0x25e   : > { %v606_v13 = vmul.f32 %v579_v12, %v579_v12 }
 0x25f   : > { %v603_v5 = vmul.f32 %v602_v4, %v590_v1 }
 0x261   : > { %v604_v7 = vand.u32 2147483647, %v603_v5 }
 0x263   : > { %v605_v8 = vmax.f32 %v604_v7, 1e-09 }
 0x265   : > { %938 = vrcp.f32 %v605_v8 }
 0x272   : > { %v939_v16 = vpop.eup %938 }
 0x273   : > { %v608_v17 = vmul.f32 %v939_v16, %v606_v13 }
 0x275   : > { %v609_v19 = vsub.f32 1.0, %v608_v17 }
 0x277   : > { %v610_v21 = vmin.f32 %v609_v19, 10.0 }
 0x279   : > { %v614_v22 = vmul.f32 %v612_v18, %v610_v21 }
 0x27b   : > { %v618_v24 = vcombine.high %v614_v22, %v614_v22 }
 0x27d   : > { %v625_v26 = vrot.slane %v618_v24, %v624_v23 }
 0x27f   : > { %v626_v27 = vcombine.high %v625_v26, %v625_v26 }
 0x281   : > { %v633_v28 = vrot.slane %v626_v27, %v624_v23 }
 0x283   : > { %v634_v30 = vcombine.high %v633_v28, %v633_v28  ;;  %643 = sbr.rel (%p826_p12) target bundleno = 656 (0x290), region = 52 }
 0x285   : > { %v636_v31 = vadd.f32 %v634_v30, %v615_v29 }
 0x287   : > { %638 = vst [vmem:[#allocation2] sm:$0x1] %v636_v31 }
 0x288   : > { %v646_v25 = vld [vmem:[#allocation3] sm:$0x1]  ;;  %v648_v33 = vld [vmem:[#allocation4] sm:$0x1] }
 0x289   : > { %647 = vst [vmem:[%s1223_s5 + $0x1] sm:$0x1] %v646_v25  ;;  %649 = vst [vmem:[%s1223_s5 + $0x2] sm:$0x1] %v648_v33 }
 0x28e   : > { %v644_v32 = vld [vmem:[#allocation2] sm:$0x1] }
 0x28f   : > { %645 = vst [vmem:[%s1223_s5] sm:$0x1] %v644_v32 }
 0x290 PF: > { %s19_s24 = sadd.s32 1, %s1064_s24   ;;  %s1308_s17 = smov %s1040_s18 }
 0x291   : > { %p16_p13 = scmp.ge.s32.totalorder %s19_s24, 6   ;;  %s1309_s18 = smov %s1044_s19 }
 0x292   : > { %s1310_s19 = smov %s1195_s11  ;;  %s1311_s20 = smov %s1056_s22 }
 0x293   : > { %s1312_s21 = smov %s1060_s23  ;;  %s1313_s22 = smov %s1316_s9 }
 0x294   : > { %s1314_s23 = smov %s1320_s10  ;;  %18 = sbr.rel (!%p16_p13) target bundleno = 9 (0x9), region = 89 }
 0x299   :  { %669 = vsyncpa [#allocation8], 1 }
 0x29a   :  { %671 = vsyncpa [#allocation8 + $0x1], 1 }
 0x29b   :  { %672 = vsyncpa [#allocation10], 1 }
 0x29c   :  { %674 = vsyncpa [#allocation10 + $0x1], 1 }

// kernel: tpu_custom_call.1
= control target key start
LH: loop header
LB: loop body
LE: loop exit
PB: predicated region body
PF: predicated region fallthrough
CT: control target
= control target key end

     0   :  { %s1360_s0 = inlined_call_operand.<no memory space> [shape: s32[1], index: 0, kind: input, shape index: {}]   ;;  %s1361_s1 = inlined_call_operand.hbm [shape: f32[16,64], index: 1, kind: input, shape index: {}]   ;;  %s1362_s2 = inlined_call_operand.hbm [shape: s32[2,512], index: 2, kind: input, shape index: {}]   ;;  %s1363_s3 = inlined_call_operand.vmem [shape: s32[2,128], index: 3, kind: input, shape index: {}]   ;;  %s1364_s4 = inlined_call_operand.vmem [shape: f32[2,3,128], index: 4, kind: output, shape index: {}]  }
   0x1   :  { %1365 = sst [smem:[#allocation13_spill]] %s1361_s1 }
   0x2   :  { %9 = sst [smem:[#allocation6]] %s1360_s0 }
   0x3   :  { %10 = vsyncpa [#allocation8], 0 }
   0x4   :  { %11 = vsyncpa [#allocation10], 0 }
   0x5   :  { %13 = vsyncpa [#allocation10 + $0x1], 0  ;;  %s1168_s17 = smov 0   ;;  %s1170_s18 = smov 0  }
   0x6   :  { %s1172_s19 = smov 0   ;;  %s1174_s20 = smov 0  }
   0x7   :  { %s1176_s21 = smov 0   ;;  %s1178_s22 = smov 0  }
   0x8   :  { %s1180_s23 = smov 0   ;;  %s1182_s24 = smov 0  }
   0x9 LB: > { %s787_s0 = sadd.s32 4294967295, %s1127_s24   ;;  %p76_p0 = scmp.ne.s32.totalorder %s1103_s18, %s1099_s17  ;;  %s1127_s24 = sphi %s1182_s24, %s19_s24   ;;  %s1123_s23 = sphi %s1180_s23, %s1377_s23   ;;  %s1119_s22 = sphi %s1178_s22, %s1376_s22   ;;  %s1115_s21 = sphi %s1176_s21, %s1375_s21   ;;  %s1111_s20 = sphi %s1174_s20, %s1374_s20   ;;  %s1107_s19 = sphi %s1172_s19, %s1373_s19   ;;  %s1103_s18 = sphi %s1170_s18, %s1372_s18   ;;  %s1099_s17 = sphi %s1168_s17, %s1371_s17  }
   0xa   : > { %p1208_p1 = scmp.eq.s32.totalorder %s787_s0, 0  ;;  %p791_p2 = scmp.ge.s32.totalorder %s1127_s24, 1 }
   0xb   : > { %p134_p3 = scmp.lt.s32.totalorder %s1127_s24, 5  ;;  %s1129_s28 = smov [#allocation7]  }
   0xc   : > { %p1216_p4 = por %p1208_p1, %p76_p0  ;;  %s146_s29 = sshll.u32 %s1129_s28, 4  ;;  %s147_s29 = int_to_ptr.vmem [resolvable:$true] %s146_s29 }
   0xd   : > { %p1220_p5 = pnand %p791_p2, %p134_p3  ;;  %s1014_s30 = scalar_lea.vmem %s147_s29, 256 }
   0xe   : > { %p1015_p9 = scmp.ne.s32.totalorder %s147_s29, %s1014_s30  ;;  %p1022_p12 = scmp.lt.s32.totalorder %s147_s29, %s147_s29 }
   0xf   : > { %p914_p6 = pneg %p1220_p5  ;;  %p1023_p13 = scmp.lt.s32.totalorder %s1014_s30, %s1014_s30 }
  0x11   : > { %p915_p7 = pnand %p914_p6, %p1208_p1  ;;  %p1024_p0 = por %p1023_p13, %p1022_p12 }
  0x13   : > { %p1005_p8 = pneg %p915_p7 }
  0x15   : > { %p1017_p10 = pnand %p1015_p9, %p1005_p8 }
  0x17   : > { %p1018_p11 = pneg %p1017_p10 }
  0x19   : > { %p1025_p2 = pnand %p1024_p0, %p1018_p11 }
  0x1b   : > { %1028 = shalt.err (!%p1025_p2)
}
  0x1c   : > { %s1130_s5 = smov 128   ;;  %s1131_s6 = smov 8  }
  0x1d   : > { %s1369_s1 = sld [smem:[#allocation13_spill]]  ;;  %s28_s9 = sadd.s32 1, %s1119_s22 }
  0x1e   : > { %p29_p3 = scmp.ge.s32.totalorder %s28_s9, 2  ;;  %s31_s10 = sadd.s32 1, %s1123_s23 }
  0x1f   : > { %s789_s11 = sshll.u32 %s1123_s23, 1  ;;  %s63_s12 = sadd.s32 1, %s1107_s19 }
  0x20   : > { %s1379_s9 = smov (%p29_p3, %s28_s9), 0  ;;  %s1381_s10 = smov (!%p29_p3, %s31_s10), %s1123_s23 }
  0x21   : > { %s57_s13 = sadd.s32 %s1119_s22, %s789_s11  ;;  %p70_p6 = scmp.ne.s32.totalorder %s1107_s19, %s1103_s18 }
  0x22   : > { %p33_p8 = scmp.ge.s32.totalorder %s1381_s10, 2  ;;  %p71_p9 = scmp.eq.s32.totalorder %s1127_s24, 0 }
  0x23   : > { %917 = dma.hbm_to_vmem [thread:$0]  (!%p915_p7), %s1369_s1, 256, %s147_s29, [#allocation8], %s1130_s5, %s1130_s5, %s1131_s6  }
  0x24   : > { %p923_p10 = scmp.lt.s32.totalorder %s1127_s24, 4  ;;  %s163_s14 = sand.u32 1, %s1107_s19  }
  0x25   : > { %s1383_s10 = smov (%p33_p8, %s1381_s10), 0  ;;  %p72_p7 = por %p71_p9, %p70_p6 }
  0x26   : > { %s790_s15 = sshll.u32 %s1383_s10, 1  ;;  %s794_s16 = sshll.u32 %s163_s14, 1 }
  0x27   : > { %s59_s17 = sadd.s32 %s790_s15, %s1379_s9  ;;  %s796_s28 = sshll.u32 %s57_s13, 5 }
  0x28   : > { %s60_s0 = ssub.s32 %s57_s13, %s59_s17  ;;  %s174_s5 = scalar_lea.hbm %s1362_s2, %s796_s28 }
  0x29   : > { %p61_p11 = scmp.eq.s32.totalorder %s60_s0, 0  ;;  %s167_s6 = scalar_lea.vmem [#allocation9], %s794_s16 }
  0x2a   : > { %s176_s7 = sshll.u32 %s167_s6, 4  ;;  %p1253_p12 = pnand %p923_p10, %p72_p7  ;;  %s177_s7 = int_to_ptr.vmem [resolvable:$true] %s176_s7 }
  0x2b   : > { %s1258_s11 = scalar_select %p61_p11, %s1107_s19, %s63_s12  }
  0x2c   : > { %s164_s1 = scalar_lea.sflag [#allocation10], %s163_s14  ;;  %p1031_p13 = pneg %p1253_p12 }
  0x2d   : > { %s1042_s13 = scalar_lea.vmem %s177_s7, 32  ;;  %s1132_s15 = smov [#allocation9]  }
  0x2e   : > { %p1043_p0 = scmp.ne.s32.totalorder %s177_s7, %s1042_s13  ;;  %s1047_s17 = sshll.u32 %s1132_s15, 4  ;;  %s1048_s17 = int_to_ptr.vmem [resolvable:$false] %s1047_s17 }
  0x2f   : > { %s1049_s16 = scalar_lea.vmem %s1048_s17, 64  ;;  %p1050_p6 = scmp.lt.s32.totalorder %s177_s7, %s1048_s17 }
  0x30   : > { %p1045_p2 = pnand %p1043_p0, %p1031_p13  ;;  %p1051_p8 = scmp.lt.s32.totalorder %s1049_s16, %s1042_s13 }
  0x32   : > { %p1046_p3 = pneg %p1045_p2  ;;  %p1052_p9 = por %p1051_p8, %p1050_p6 }
  0x34   : > { %p1053_p10 = pnand %p1052_p9, %p1046_p3 }
  0x36   : > { %1056 = shalt.err (!%p1053_p10)
}
  0x37   : > { %921 = dma.hbm_to_vmem [thread:$0]  (!%p1253_p12), %s174_s5, 32, %s177_s7, %s164_s1  }
  0x38   : > { %185 = sbr.rel (%p1220_p5) target bundleno = 654 (0x28e), region = 32 }
  0x3d   : > { %1090 = dma.done.wait (%p1208_p1), [#allocation8], 256  }
  0x3e   : > { %1092 = vsyncadd (%p1208_p1), [#allocation8], 4294967040  ;;  %s191_s12 = sand.u32 1, %s1103_s18  }
  0x3f   : > { %s1271_s14 = sshll.u32 %s191_s12, 1  ;;  %s192_s0 = scalar_lea.sflag [#allocation10], %s191_s12 }
  0x40   : > { %s195_s28 = scalar_lea.vmem [#allocation9], %s1271_s14 }
  0x41   : > { %1094 = dma.done.wait (%p1216_p4), %s192_s0, 32  }
  0x42   : > { %1096 = vsyncadd (%p1216_p4), %s192_s0, 4294967264  ;;  %p219_p5 = scmp.lt.s32.totalorder %s1115_s21, 1  ;;  %p224_p7 = scmp.eq.s32.totalorder %s1111_s20, 0 }
  0x43   : > { %s1280_s1 = sld [smem:[#allocation6]]  ;;  %p801_p1 = scmp.ne.s32.totalorder %s1111_s20, 0 }
  0x44   : > { %s220_s25 = scalar_select %p219_p5, %s1115_s21, 1 }
  0x45   : > { %227 = sbr.rel (%p801_p1) target bundleno = 77 (0x4d), region = 44 }
  0x46   : > { %s800_s27 = sshll.u32 %s220_s25, 2 }
  0x47   : > { %s1286_s5 = scalar_lea.vmem %s1364_s4, %s800_s27 }
  0x4a   : > { %v1133_v0 = vmov 0.0  }
  0x4b   : > { %228 = vst [vmem:[#allocation2] sm:$0x1] %v1133_v0  ;;  %229 = vst [vmem:[#allocation3] sm:$0x1] %v1133_v0 }
  0x4c   : > { %230 = vst [vmem:[#allocation4] sm:$0x1] %v1133_v0 }
  0x4d PF: > { %p231_p4 = scmp.eq.s32.totalorder %s1115_s21, 0 }
  0x4f   : > { %p232_p11 = pnand %p231_p4, %p224_p7 }
  0x51   : > { %235 = sbr.rel (%p232_p11) target bundleno = 366 (0x16e), region = 48 }
  0x56   : > { %v238_v1 = vlaneseq  ;;  %v1134_v2 = vmov 0.0   ;;  %v803_v4 = vld [vmem:[%s1363_s3 + $0x1] ss:$0 sm:$0xff]  ;;  %v802_v5 = vld [vmem:[%s1363_s3] ss:$0 sm:$0xff]  ;;  %v1135_v10 = vmov 1.0  }
  0x57   : > { %376 = vmatprep.mubr.f32.mxu0 %v1134_v2  ;;  %382 = vmatprep.mubr.f32.mxu1 %v1134_v2  ;;  %v303_v14 = vld [vmem:[#allocation7] sm:$0xff]  ;;  %v304_v15 = vld [vmem:[#allocation7 + $0x8] sm:$0xff]  ;;  %v1136_v61 = vmov 1966171168  }
  0x58   : > { %v1292_v3 = vshrl.u32 %v238_v1, 7  ;;  %v438_v62 = vunpack.c.l.s4 %v1136_v61 }
  0x5a   : > { %v246_v6 = vadd.s32 56, %v1292_v3  ;;  %v245_v7 = vadd.s32 48, %v1292_v3  ;;  %v244_v8 = vadd.s32 40, %v1292_v3  ;;  %v243_v9 = vadd.s32 32, %v1292_v3 }
  0x5b   : > { %v242_v11 = vadd.s32 24, %v1292_v3  ;;  %v241_v12 = vadd.s32 16, %v1292_v3  ;;  %v240_v13 = vadd.s32 8, %v1292_v3  ;;  %vm256_vm14 = vcmp.eq.s32.totalorder %v1292_v3, %v803_v4 }
  0x5c   : > { %vm270_vm0 = vcmp.eq.s32.totalorder %v246_v6, %v803_v4  ;;  %vm269_vm1 = vcmp.eq.s32.totalorder %v246_v6, %v802_v5  ;;  %vm268_vm2 = vcmp.eq.s32.totalorder %v245_v7, %v803_v4  ;;  %vm267_vm3 = vcmp.eq.s32.totalorder %v245_v7, %v802_v5 }
  0x5d   : > { %820 = vmatprep.subr.msk.mxu0 %vm270_vm0, %v1135_v10  ;;  %876 = vmatprep.subr.msk.mxu1 %vm270_vm0, %v1135_v10  ;;  %vm266_vm4 = vcmp.eq.s32.totalorder %v244_v8, %v803_v4  ;;  %vm265_vm5 = vcmp.eq.s32.totalorder %v244_v8, %v802_v5  ;;  %vm264_vm6 = vcmp.eq.s32.totalorder %v243_v9, %v803_v4  ;;  %vm305_vm0 = vcmask 523264  }
  0x5e   : > { %821 = vmatpush1.msk.msra.mxu0 %vm269_vm1, %v1135_v10  ;;  %884 = vmatpush1.msk.msra.mxu1 %vm269_vm1, %v1135_v10  ;;  %vm263_vm7 = vcmp.eq.s32.totalorder %v243_v9, %v802_v5  ;;  %vm262_vm8 = vcmp.eq.s32.totalorder %v242_v11, %v803_v4  ;;  %vm261_vm9 = vcmp.eq.s32.totalorder %v242_v11, %v802_v5  ;;  %v439_v1 = vunpack.c.0.s8 %v438_v62 }
  0x5f   : > { %822 = vmatprep.subr.msk.mxu0 %vm268_vm2, %v1135_v10  ;;  %877 = vmatprep.subr.msk.mxu1 %vm268_vm2, %v1135_v10  ;;  %vm260_vm10 = vcmp.eq.s32.totalorder %v241_v12, %v803_v4  ;;  %vm259_vm11 = vcmp.eq.s32.totalorder %v241_v12, %v802_v5  ;;  %vm258_vm12 = vcmp.eq.s32.totalorder %v240_v13, %v803_v4 }
  0x60   : > { %823 = vmatpush1.msk.msra.mxu0 %vm267_vm3, %v1135_v10  ;;  %885 = vmatpush1.msk.msra.mxu1 %vm267_vm3, %v1135_v10  ;;  %vm257_vm13 = vcmp.eq.s32.totalorder %v240_v13, %v802_v5  ;;  %vm255_vm15 = vcmp.eq.s32.totalorder %v1292_v3, %v802_v5  ;;  %v442_v5 = vsub.s32 %v439_v1, %v1292_v3 }
  0x61   : > { %824 = vmatprep.subr.msk.mxu0 %vm266_vm4, %v1135_v10  ;;  %878 = vmatprep.subr.msk.mxu1 %vm266_vm4, %v1135_v10 }
  0x62   : > { %825 = vmatpush1.msk.msra.mxu0 %vm265_vm5, %v1135_v10  ;;  %886 = vmatpush1.msk.msra.mxu1 %vm265_vm5, %v1135_v10 }
  0x63   : > { %826 = vmatprep.subr.msk.mxu0 %vm264_vm6, %v1135_v10  ;;  %879 = vmatprep.subr.msk.mxu1 %vm264_vm6, %v1135_v10 }
  0x64   : > { %827 = vmatpush1.msk.msra.mxu0 %vm263_vm7, %v1135_v10  ;;  %887 = vmatpush1.msk.msra.mxu1 %vm263_vm7, %v1135_v10 }
  0x65   : > { %828 = vmatprep.subr.msk.mxu0 %vm262_vm8, %v1135_v10  ;;  %880 = vmatprep.subr.msk.mxu1 %vm262_vm8, %v1135_v10 }
  0x66   : > { %829 = vmatpush1.msk.msra.mxu0 %vm261_vm9, %v1135_v10  ;;  %888 = vmatpush1.msk.msra.mxu1 %vm261_vm9, %v1135_v10 }
  0x67   : > { %830 = vmatprep.subr.msk.mxu0 %vm260_vm10, %v1135_v10  ;;  %881 = vmatprep.subr.msk.mxu1 %vm260_vm10, %v1135_v10 }
  0x68   : > { %831 = vmatpush1.msk.msra.mxu0 %vm259_vm11, %v1135_v10  ;;  %889 = vmatpush1.msk.msra.mxu1 %vm259_vm11, %v1135_v10 }
  0x69   : > { %832 = vmatprep.subr.msk.mxu0 %vm258_vm12, %v1135_v10  ;;  %882 = vmatprep.subr.msk.mxu1 %vm258_vm12, %v1135_v10 }
  0x6a   : > { %833 = vmatpush1.msk.msra.mxu0 %vm257_vm13, %v1135_v10  ;;  %890 = vmatpush1.msk.msra.mxu1 %vm257_vm13, %v1135_v10 }
  0x6b   : > { %834 = vmatprep.subr.msk.mxu0 %vm256_vm14, %v1135_v10  ;;  %883 = vmatprep.subr.msk.mxu1 %vm256_vm14, %v1135_v10 }
  0x6c   : > { %835 = vmatpush1.msk.msra.mxu0 %vm255_vm15, %v1135_v10  ;;  %891 = vmatpush1.msk.msra.mxu1 %vm255_vm15, %v1135_v10  ;;  %v434_v10 = vld [vmem:[#allocation3] sm:$0x1] }
  0x6d   : > { %836 = vmatmul.mubr.msk.f32.vlgmr.msra.gmra.mxu0 %vm305_vm0, %v303_v14  ;;  %837 = vmatmul.mubr.msk.f32.vlgmr.msra.gmra.mxu1 %vm305_vm0, %v304_v15 }
 0x12d   : > { %v378_v16 = vpop.f32.mrf.mxu0  ;;  %v384_v17 = vpop.f32.mrf.mxu1 }
 0x12e   : > { %v401_v18 = vmul.f32 %v378_v16, %v378_v16  ;;  %v402_v19 = vmul.f32 %v384_v17, %v384_v17  ;;  %v398_v38 = vmul.f32 2.0, %v384_v17 }
 0x12f   : > { %v380_v20 = vpop.f32.mrf.mxu0  ;;  %v386_v21 = vpop.f32.mrf.mxu1 }
 0x130   : > { %v403_v22 = vadd.f32 %v402_v19, %v401_v18  ;;  %v412_v23 = vmul.f32 %v380_v20, %v380_v20  ;;  %v389_v24 = vmul.f32 %v380_v20, %v378_v16  ;;  %v390_v25 = vmul.f32 %v386_v21, %v384_v17 }
 0x131   : > { %v413_v26 = vmul.f32 %v386_v21, %v386_v21  ;;  %v421_v40 = vmul.f32 2.0, %v386_v21  ;;  %v410_v44 = vmul.f32 %v398_v38, %v384_v17  ;;  %v399_v56 = vmul.f32 %v398_v38, %v386_v21 }
 0x132   : > { %v404_v27 = vrot.slane %v403_v22, 4  ;;  %v391_v30 = vadd.f32 %v390_v25, %v389_v24 }
 0x133   : > { %v414_v28 = vadd.f32 %v413_v26, %v412_v23  ;;  %v422_v46 = vmul.f32 %v421_v40, %v386_v21 }
 0x134   : > { %v405_v29 = vadd.f32 %v404_v27, %v403_v22  ;;  %v392_v35 = vrot.slane %v391_v30, 4 }
 0x135   : > { %v415_v31 = vrot.slane %v414_v28, 4 }
 0x136   : > { %v406_v32 = vrot.slane %v405_v29, 2  ;;  %v393_v42 = vadd.f32 %v392_v35, %v391_v30 }
 0x137   : > { %v416_v33 = vadd.f32 %v415_v31, %v414_v28 }
 0x138   : > { %v407_v34 = vadd.f32 %v406_v32, %v405_v29  ;;  %v394_v48 = vrot.slane %v393_v42, 2 }
 0x139   : > { %v417_v36 = vrot.slane %v416_v33, 2 }
 0x13a   : > { %v408_v37 = vrot.slane %v407_v34, 1  ;;  %v395_v51 = vadd.f32 %v394_v48, %v393_v42 }
 0x13b   : > { %v418_v39 = vadd.f32 %v417_v36, %v416_v33 }
 0x13c   : > { %v409_v41 = vadd.f32 %v408_v37, %v407_v34  ;;  %v396_v54 = vrot.slane %v395_v51, 1 }
 0x13d   : > { %v419_v43 = vrot.slane %v418_v39, 1 }
 0x13e   : > { %v411_v47 = vsub.f32 %v409_v41, %v410_v44  ;;  %v397_v55 = vadd.f32 %v396_v54, %v395_v51 }
 0x13f   : > { %v420_v45 = vadd.f32 %v419_v43, %v418_v39 }
 0x140   : > { %v400_v57 = vsub.f32 %v397_v55, %v399_v56 }
 0x141   : > { %v423_v49 = vsub.f32 %v420_v45, %v422_v46 }
 0x142   : > { %v427_v58 = vmul.f32 %v400_v57, %v400_v57 }
 0x143   : > { %v424_v50 = vmul.f32 %v423_v49, %v411_v47 }
 0x145   : > { %v425_v52 = vand.u32 2147483647, %v424_v50 }
 0x147   : > { %v426_v53 = vmax.f32 %v425_v52, 1e-09 }
 0x149   : > { %999 = vrcp.f32 %v426_v53 }
 0x156   : > { %v1000_v59 = vpop.eup %999 }
 0x157   : > { %v429_v60 = vmul.f32 %v1000_v59, %v427_v58 }
 0x159   : > { %v430_v63 = vsub.f32 1.0, %v429_v60 }
 0x15b   : > { %v431_v0 = vmin.f32 %v430_v63, 10.0 }
 0x15d   : > { %v432_v2 = vsub.f32 1.0, %v431_v0 }
 0x15f   : > { %v433_v4 = vmax.f32 %v432_v2, 0.0 }
 0x161   : > { %v436_v6 = vcombine.high %v433_v4, %v433_v4 }
 0x163   : > { %v443_v7 = vrot.slane %v436_v6, %v442_v5 }
 0x165   : > { %v444_v8 = vcombine.high %v443_v7, %v443_v7 }
 0x167   : > { %v451_v9 = vrot.slane %v444_v8, %v442_v5 }
 0x169   : > { %v452_v11 = vcombine.high %v451_v9, %v451_v9 }
 0x16b   : > { %v454_v12 = vadd.f32 %v452_v11, %v434_v10 }
 0x16d   : > { %455 = vst [vmem:[#allocation3] sm:$0x1] %v454_v12 }
 0x16e PF: > { %v457_v13 = vld [vmem:[%s195_s28 + $0x1] sm:$0x1]  ;;  %v464_v14 = vlaneseq  ;;  %v456_v15 = vld [vmem:[%s195_s28] sm:$0x1]  ;;  %v458_v16 = vstv %s1280_s1  ;;  %v1137_v3 = vmov 0.0   ;;  %v1138_v28 = vmov 1.0  }
 0x16f   : > { %vm459_vm1 = vcmp.lt.s32.totalorder %v456_v15, %v458_v16  ;;  %vm460_vm2 = vcmp.lt.s32.totalorder %v457_v13, %v458_v16  ;;  %602 = vmatprep.mubr.f32.mxu0 %v1137_v3  ;;  %608 = vmatprep.mubr.f32.mxu1 %v1137_v3  ;;  %v663_v18 = vld [vmem:[#allocation4] sm:$0x1]  ;;  %v529_v32 = vld [vmem:[#allocation7] sm:$0xff]  ;;  %v530_v33 = vld [vmem:[#allocation7 + $0x8] sm:$0xff]  ;;  %p873_p12 = scmp.ne.s32.totalorder %s1111_s20, 1 }
 0x170   : > { %v1315_v17 = vshrl.u32 %v464_v14, 7  ;;  %vm461_vm3 = vmand %vm459_vm1, %vm460_vm2  ;;  %v1139_v14 = vmov 1966171168  }
 0x171   : > { %v1320_v22 = vsel %vm461_vm3, 1.0, %v1137_v3 }
 0x172   : > { %v472_v19 = vadd.s32 56, %v1315_v17  ;;  %v475_v20 = vsub.s32 0, %v1315_v17  ;;  %v471_v21 = vadd.s32 48, %v1315_v17  ;;  %v470_v25 = vadd.s32 40, %v1315_v17 }
 0x173   : > { %v684_v26 = vadd.f32 %v1320_v22, %v663_v18  ;;  %v469_v27 = vadd.s32 32, %v1315_v17  ;;  %v468_v29 = vadd.s32 24, %v1315_v17  ;;  %v467_v30 = vadd.s32 16, %v1315_v17 }
 0x174   : > { %v480_v23 = vrot.slane %v457_v13, %v475_v20  ;;  %v476_v24 = vrot.slane %v456_v15, %v475_v20  ;;  %v466_v31 = vadd.s32 8, %v1315_v17  ;;  %v667_v15 = vunpack.c.l.s4 %v1139_v14 }
 0x175   : > { %686 = vst [vmem:[#allocation4] sm:$0x1] %v684_v26  ;;  %v659_v18 = vrot.slane %v1320_v22, 1 }
 0x176   : > { %vm496_vm4 = vcmp.eq.s32.totalorder %v472_v19, %v480_v23  ;;  %vm495_vm5 = vcmp.eq.s32.totalorder %v472_v19, %v476_v24  ;;  %vm494_vm6 = vcmp.eq.s32.totalorder %v471_v21, %v480_v23  ;;  %vm493_vm7 = vcmp.eq.s32.totalorder %v471_v21, %v476_v24 }
 0x177   : > { %855 = vmatprep.subr.msk.mxu0 %vm496_vm4, %v1138_v28  ;;  %892 = vmatprep.subr.msk.mxu1 %vm496_vm4, %v1138_v28  ;;  %vm492_vm8 = vcmp.eq.s32.totalorder %v470_v25, %v480_v23  ;;  %vm491_vm9 = vcmp.eq.s32.totalorder %v470_v25, %v476_v24  ;;  %vm490_vm10 = vcmp.eq.s32.totalorder %v469_v27, %v480_v23  ;;  %vm531_vm4 = vcmask 523264  }
 0x178   : > { %856 = vmatpush1.msk.msra.mxu0 %vm495_vm5, %v1138_v28  ;;  %900 = vmatpush1.msk.msra.mxu1 %vm495_vm5, %v1138_v28  ;;  %vm489_vm11 = vcmp.eq.s32.totalorder %v469_v27, %v476_v24  ;;  %vm488_vm12 = vcmp.eq.s32.totalorder %v468_v29, %v480_v23  ;;  %vm487_vm13 = vcmp.eq.s32.totalorder %v468_v29, %v476_v24  ;;  %v668_v20 = vunpack.c.0.s8 %v667_v15  ;;  %v662_v29 = vld [vmem:[#allocation2] sm:$0x1] }
 0x179   : > { %857 = vmatprep.subr.msk.mxu0 %vm494_vm6, %v1138_v28  ;;  %893 = vmatprep.subr.msk.mxu1 %vm494_vm6, %v1138_v28  ;;  %vm486_vm14 = vcmp.eq.s32.totalorder %v467_v30, %v480_v23  ;;  %vm485_vm15 = vcmp.eq.s32.totalorder %v467_v30, %v476_v24  ;;  %vm484_vm0 = vcmp.eq.s32.totalorder %v466_v31, %v480_v23 }
 0x17a   : > { %858 = vmatpush1.msk.msra.mxu0 %vm493_vm7, %v1138_v28  ;;  %901 = vmatpush1.msk.msra.mxu1 %vm493_vm7, %v1138_v28  ;;  %vm483_vm1 = vcmp.eq.s32.totalorder %v466_v31, %v476_v24  ;;  %vm482_vm2 = vcmp.eq.s32.totalorder %v1315_v17, %v480_v23  ;;  %vm481_vm3 = vcmp.eq.s32.totalorder %v1315_v17, %v476_v24 }
 0x17b   : > { %859 = vmatprep.subr.msk.mxu0 %vm492_vm8, %v1138_v28  ;;  %894 = vmatprep.subr.msk.mxu1 %vm492_vm8, %v1138_v28  ;;  %v671_v24 = vsub.s32 %v668_v20, %v1315_v17 }
 0x17c   : > { %860 = vmatpush1.msk.msra.mxu0 %vm491_vm9, %v1138_v28  ;;  %902 = vmatpush1.msk.msra.mxu1 %vm491_vm9, %v1138_v28 }
 0x17d   : > { %861 = vmatprep.subr.msk.mxu0 %vm490_vm10, %v1138_v28  ;;  %895 = vmatprep.subr.msk.mxu1 %vm490_vm10, %v1138_v28 }
 0x17e   : > { %862 = vmatpush1.msk.msra.mxu0 %vm489_vm11, %v1138_v28  ;;  %903 = vmatpush1.msk.msra.mxu1 %vm489_vm11, %v1138_v28 }
 0x17f   : > { %863 = vmatprep.subr.msk.mxu0 %vm488_vm12, %v1138_v28  ;;  %896 = vmatprep.subr.msk.mxu1 %vm488_vm12, %v1138_v28 }
 0x180   : > { %864 = vmatpush1.msk.msra.mxu0 %vm487_vm13, %v1138_v28  ;;  %904 = vmatpush1.msk.msra.mxu1 %vm487_vm13, %v1138_v28 }
 0x181   : > { %865 = vmatprep.subr.msk.mxu0 %vm486_vm14, %v1138_v28  ;;  %897 = vmatprep.subr.msk.mxu1 %vm486_vm14, %v1138_v28 }
 0x182   : > { %866 = vmatpush1.msk.msra.mxu0 %vm485_vm15, %v1138_v28  ;;  %905 = vmatpush1.msk.msra.mxu1 %vm485_vm15, %v1138_v28 }
 0x183   : > { %867 = vmatprep.subr.msk.mxu0 %vm484_vm0, %v1138_v28  ;;  %898 = vmatprep.subr.msk.mxu1 %vm484_vm0, %v1138_v28 }
 0x184   : > { %868 = vmatpush1.msk.msra.mxu0 %vm483_vm1, %v1138_v28  ;;  %906 = vmatpush1.msk.msra.mxu1 %vm483_vm1, %v1138_v28 }
 0x185   : > { %869 = vmatprep.subr.msk.mxu0 %vm482_vm2, %v1138_v28  ;;  %899 = vmatprep.subr.msk.mxu1 %vm482_vm2, %v1138_v28 }
 0x186   : > { %870 = vmatpush1.msk.msra.mxu0 %vm481_vm3, %v1138_v28  ;;  %907 = vmatpush1.msk.msra.mxu1 %vm481_vm3, %v1138_v28 }
 0x187   : > { %871 = vmatmul.mubr.msk.f32.vlgmr.msra.gmra.mxu0 %vm531_vm4, %v529_v32  ;;  %872 = vmatmul.mubr.msk.f32.vlgmr.msra.gmra.mxu1 %vm531_vm4, %v530_v33 }
 0x247   : > { %v604_v34 = vpop.f32.mrf.mxu0  ;;  %v610_v35 = vpop.f32.mrf.mxu1 }
 0x248   : > { %v627_v36 = vmul.f32 %v604_v34, %v604_v34  ;;  %v628_v37 = vmul.f32 %v610_v35, %v610_v35  ;;  %v624_v56 = vmul.f32 2.0, %v610_v35 }
 0x249   : > { %v606_v38 = vpop.f32.mrf.mxu0  ;;  %v612_v39 = vpop.f32.mrf.mxu1 }
 0x24a   : > { %v629_v40 = vadd.f32 %v628_v37, %v627_v36  ;;  %v638_v41 = vmul.f32 %v606_v38, %v606_v38  ;;  %v615_v42 = vmul.f32 %v606_v38, %v604_v34  ;;  %v616_v43 = vmul.f32 %v612_v39, %v610_v35 }
 0x24b   : > { %v639_v44 = vmul.f32 %v612_v39, %v612_v39  ;;  %v647_v58 = vmul.f32 2.0, %v612_v39  ;;  %v636_v62 = vmul.f32 %v624_v56, %v610_v35  ;;  %v625_v11 = vmul.f32 %v624_v56, %v612_v39 }
 0x24c   : > { %v630_v45 = vrot.slane %v629_v40, 4  ;;  %v617_v48 = vadd.f32 %v616_v43, %v615_v42 }
 0x24d   : > { %v640_v46 = vadd.f32 %v639_v44, %v638_v41  ;;  %v648_v0 = vmul.f32 %v647_v58, %v612_v39 }
 0x24e   : > { %v631_v47 = vadd.f32 %v630_v45, %v629_v40  ;;  %v618_v53 = vrot.slane %v617_v48, 4 }
 0x24f   : > { %v641_v49 = vrot.slane %v640_v46, 4 }
 0x250   : > { %v632_v50 = vrot.slane %v631_v47, 2  ;;  %v619_v60 = vadd.f32 %v618_v53, %v617_v48 }
 0x251   : > { %v642_v51 = vadd.f32 %v641_v49, %v640_v46 }
 0x252   : > { %v633_v52 = vadd.f32 %v632_v50, %v631_v47  ;;  %v620_v2 = vrot.slane %v619_v60, 2 }
 0x253   : > { %v643_v54 = vrot.slane %v642_v51, 2 }
 0x254   : > { %v634_v55 = vrot.slane %v633_v52, 1  ;;  %v621_v6 = vadd.f32 %v620_v2, %v619_v60 }
 0x255   : > { %v644_v57 = vadd.f32 %v643_v54, %v642_v51 }
 0x256   : > { %v635_v59 = vadd.f32 %v634_v55, %v633_v52  ;;  %v622_v9 = vrot.slane %v621_v6, 1 }
 0x257   : > { %v645_v61 = vrot.slane %v644_v57, 1 }
 0x258   : > { %v637_v1 = vsub.f32 %v635_v59, %v636_v62  ;;  %v623_v10 = vadd.f32 %v622_v9, %v621_v6 }
 0x259   : > { %v646_v63 = vadd.f32 %v645_v61, %v644_v57 }
 0x25a   : > { %v626_v12 = vsub.f32 %v623_v10, %v625_v11 }
 0x25b   : > { %v649_v4 = vsub.f32 %v646_v63, %v648_v0 }
 0x25c   : > { %v653_v13 = vmul.f32 %v626_v12, %v626_v12 }
 0x25d   : > { %v650_v5 = vmul.f32 %v649_v4, %v637_v1 }
 0x25f   : > { %v651_v7 = vand.u32 2147483647, %v650_v5 }
 0x261   : > { %v652_v8 = vmax.f32 %v651_v7, 1e-09 }
 0x263   : > { %1001 = vrcp.f32 %v652_v8 }
 0x270   : > { %v1002_v16 = vpop.eup %1001 }
 0x271   : > { %v655_v3 = vmul.f32 %v1002_v16, %v653_v13 }
 0x273   : > { %v656_v19 = vsub.f32 1.0, %v655_v3 }
 0x275   : > { %v657_v21 = vmin.f32 %v656_v19, 10.0 }
 0x277   : > { %v661_v23 = vmul.f32 %v659_v18, %v657_v21 }
 0x279   : > { %v665_v25 = vcombine.high %v661_v23, %v661_v23 }
 0x27b   : > { %v672_v26 = vrot.slane %v665_v25, %v671_v24 }
 0x27d   : > { %v673_v27 = vcombine.high %v672_v26, %v672_v26 }
 0x27f   : > { %v680_v28 = vrot.slane %v673_v27, %v671_v24 }
 0x281   : > { %v681_v30 = vcombine.high %v680_v28, %v680_v28  ;;  %690 = sbr.rel (%p873_p12) target bundleno = 654 (0x28e), region = 52 }
 0x283   : > { %v683_v31 = vadd.f32 %v681_v30, %v662_v29 }
 0x285   : > { %685 = vst [vmem:[#allocation2] sm:$0x1] %v683_v31 }
 0x286   : > { %v693_v22 = vld [vmem:[#allocation3] sm:$0x1]  ;;  %v695_v33 = vld [vmem:[#allocation4] sm:$0x1] }
 0x287   : > { %694 = vst [vmem:[%s1286_s5 + $0x1] sm:$0x1] %v693_v22  ;;  %696 = vst [vmem:[%s1286_s5 + $0x2] sm:$0x1] %v695_v33 }
 0x28c   : > { %v691_v32 = vld [vmem:[#allocation2] sm:$0x1] }
 0x28d   : > { %692 = vst [vmem:[%s1286_s5] sm:$0x1] %v691_v32 }
 0x28e PF: > { %s19_s24 = sadd.s32 1, %s1127_s24   ;;  %s1371_s17 = smov %s1103_s18 }
 0x28f   : > { %p16_p13 = scmp.ge.s32.totalorder %s19_s24, 6   ;;  %s1372_s18 = smov %s1107_s19 }
 0x290   : > { %s1373_s19 = smov %s1258_s11  ;;  %s1374_s20 = smov %s1119_s22 }
 0x291   : > { %s1375_s21 = smov %s1123_s23  ;;  %s1376_s22 = smov %s1379_s9 }
 0x292   : > { %s1377_s23 = smov %s1383_s10  ;;  %18 = sbr.rel (!%p16_p13) target bundleno = 9 (0x9), region = 89 }
 0x297   :  { %716 = vsyncpa [#allocation8], 1 }
 0x298   :  { %718 = vsyncpa [#allocation8 + $0x1], 1 }
 0x299   :  { %719 = vsyncpa [#allocation10], 1 }
 0x29a   :  { %721 = vsyncpa [#allocation10 + $0x1], 1 }

// kernel: tpu_custom_call.1
= control target key start
LH: loop header
LB: loop body
LE: loop exit
PB: predicated region body
PF: predicated region fallthrough
CT: control target
= control target key end

     0   :  { %s1360_s0 = inlined_call_operand.<no memory space> [shape: s32[1], index: 0, kind: input, shape index: {}]   ;;  %s1361_s1 = inlined_call_operand.hbm [shape: f32[16,64], index: 1, kind: input, shape index: {}]   ;;  %s1362_s2 = inlined_call_operand.hbm [shape: s32[2,512], index: 2, kind: input, shape index: {}]   ;;  %s1363_s3 = inlined_call_operand.vmem [shape: s32[2,128], index: 3, kind: input, shape index: {}]   ;;  %s1364_s4 = inlined_call_operand.vmem [shape: f32[2,3,128], index: 4, kind: output, shape index: {}]  }
   0x1   :  { %1365 = sst [smem:[#allocation13_spill]] %s1361_s1 }
   0x2   :  { %9 = sst [smem:[#allocation6]] %s1360_s0 }
   0x3   :  { %10 = vsyncpa [#allocation8], 0 }
   0x4   :  { %11 = vsyncpa [#allocation10], 0 }
   0x5   :  { %13 = vsyncpa [#allocation10 + $0x1], 0  ;;  %s1168_s17 = smov 0   ;;  %s1170_s18 = smov 0  }
   0x6   :  { %s1172_s19 = smov 0   ;;  %s1174_s20 = smov 0  }
   0x7   :  { %s1176_s21 = smov 0   ;;  %s1178_s22 = smov 0  }
   0x8   :  { %s1180_s23 = smov 0   ;;  %s1182_s24 = smov 0  }
   0x9 LB: > { %s787_s0 = sadd.s32 4294967295, %s1127_s24   ;;  %p76_p0 = scmp.ne.s32.totalorder %s1103_s18, %s1099_s17  ;;  %s1127_s24 = sphi %s1182_s24, %s19_s24   ;;  %s1123_s23 = sphi %s1180_s23, %s1377_s23   ;;  %s1119_s22 = sphi %s1178_s22, %s1376_s22   ;;  %s1115_s21 = sphi %s1176_s21, %s1375_s21   ;;  %s1111_s20 = sphi %s1174_s20, %s1374_s20   ;;  %s1107_s19 = sphi %s1172_s19, %s1373_s19   ;;  %s1103_s18 = sphi %s1170_s18, %s1372_s18   ;;  %s1099_s17 = sphi %s1168_s17, %s1371_s17  }
   0xa   : > { %p1208_p1 = scmp.eq.s32.totalorder %s787_s0, 0  ;;  %p791_p2 = scmp.ge.s32.totalorder %s1127_s24, 1 }
   0xb   : > { %p134_p3 = scmp.lt.s32.totalorder %s1127_s24, 5  ;;  %s1129_s28 = smov [#allocation7]  }
   0xc   : > { %p1216_p4 = por %p1208_p1, %p76_p0  ;;  %s146_s29 = sshll.u32 %s1129_s28, 4  ;;  %s147_s29 = int_to_ptr.vmem [resolvable:$true] %s146_s29 }
   0xd   : > { %p1220_p5 = pnand %p791_p2, %p134_p3  ;;  %s1014_s30 = scalar_lea.vmem %s147_s29, 256 }
   0xe   : > { %p1015_p9 = scmp.ne.s32.totalorder %s147_s29, %s1014_s30  ;;  %p1022_p12 = scmp.lt.s32.totalorder %s147_s29, %s147_s29 }
   0xf   : > { %p914_p6 = pneg %p1220_p5  ;;  %p1023_p13 = scmp.lt.s32.totalorder %s1014_s30, %s1014_s30 }
  0x11   : > { %p915_p7 = pnand %p914_p6, %p1208_p1  ;;  %p1024_p0 = por %p1023_p13, %p1022_p12 }
  0x13   : > { %p1005_p8 = pneg %p915_p7 }
  0x15   : > { %p1017_p10 = pnand %p1015_p9, %p1005_p8 }
  0x17   : > { %p1018_p11 = pneg %p1017_p10 }
  0x19   : > { %p1025_p2 = pnand %p1024_p0, %p1018_p11 }
  0x1b   : > { %1028 = shalt.err (!%p1025_p2)
}
  0x1c   : > { %s1130_s5 = smov 128   ;;  %s1131_s6 = smov 8  }
  0x1d   : > { %s1369_s1 = sld [smem:[#allocation13_spill]]  ;;  %s28_s9 = sadd.s32 1, %s1119_s22 }
  0x1e   : > { %p29_p3 = scmp.ge.s32.totalorder %s28_s9, 2  ;;  %s31_s10 = sadd.s32 1, %s1123_s23 }
  0x1f   : > { %s789_s11 = sshll.u32 %s1123_s23, 1  ;;  %s63_s12 = sadd.s32 1, %s1107_s19 }
  0x20   : > { %s1379_s9 = smov (%p29_p3, %s28_s9), 0  ;;  %s1381_s10 = smov (!%p29_p3, %s31_s10), %s1123_s23 }
  0x21   : > { %s57_s13 = sadd.s32 %s1119_s22, %s789_s11  ;;  %p70_p6 = scmp.ne.s32.totalorder %s1107_s19, %s1103_s18 }
  0x22   : > { %p33_p8 = scmp.ge.s32.totalorder %s1381_s10, 2  ;;  %p71_p9 = scmp.eq.s32.totalorder %s1127_s24, 0 }
  0x23   : > { %917 = dma.hbm_to_vmem [thread:$0]  (!%p915_p7), %s1369_s1, 256, %s147_s29, [#allocation8], %s1130_s5, %s1130_s5, %s1131_s6  }
  0x24   : > { %p923_p10 = scmp.lt.s32.totalorder %s1127_s24, 4  ;;  %s163_s14 = sand.u32 1, %s1107_s19  }
  0x25   : > { %s1383_s10 = smov (%p33_p8, %s1381_s10), 0  ;;  %p72_p7 = por %p71_p9, %p70_p6 }
  0x26   : > { %s790_s15 = sshll.u32 %s1383_s10, 1  ;;  %s794_s16 = sshll.u32 %s163_s14, 1 }
  0x27   : > { %s59_s17 = sadd.s32 %s790_s15, %s1379_s9  ;;  %s796_s28 = sshll.u32 %s57_s13, 5 }
  0x28   : > { %s60_s0 = ssub.s32 %s57_s13, %s59_s17  ;;  %s174_s5 = scalar_lea.hbm %s1362_s2, %s796_s28 }
  0x29   : > { %p61_p11 = scmp.eq.s32.totalorder %s60_s0, 0  ;;  %s167_s6 = scalar_lea.vmem [#allocation9], %s794_s16 }
  0x2a   : > { %s176_s7 = sshll.u32 %s167_s6, 4  ;;  %p1253_p12 = pnand %p923_p10, %p72_p7  ;;  %s177_s7 = int_to_ptr.vmem [resolvable:$true] %s176_s7 }
  0x2b   : > { %s1258_s11 = scalar_select %p61_p11, %s1107_s19, %s63_s12  }
  0x2c   : > { %s164_s1 = scalar_lea.sflag [#allocation10], %s163_s14  ;;  %p1031_p13 = pneg %p1253_p12 }
  0x2d   : > { %s1042_s13 = scalar_lea.vmem %s177_s7, 32  ;;  %s1132_s15 = smov [#allocation9]  }
  0x2e   : > { %p1043_p0 = scmp.ne.s32.totalorder %s177_s7, %s1042_s13  ;;  %s1047_s17 = sshll.u32 %s1132_s15, 4  ;;  %s1048_s17 = int_to_ptr.vmem [resolvable:$false] %s1047_s17 }
  0x2f   : > { %s1049_s16 = scalar_lea.vmem %s1048_s17, 64  ;;  %p1050_p6 = scmp.lt.s32.totalorder %s177_s7, %s1048_s17 }
  0x30   : > { %p1045_p2 = pnand %p1043_p0, %p1031_p13  ;;  %p1051_p8 = scmp.lt.s32.totalorder %s1049_s16, %s1042_s13 }
  0x32   : > { %p1046_p3 = pneg %p1045_p2  ;;  %p1052_p9 = por %p1051_p8, %p1050_p6 }
  0x34   : > { %p1053_p10 = pnand %p1052_p9, %p1046_p3 }
  0x36   : > { %1056 = shalt.err (!%p1053_p10)
}
  0x37   : > { %921 = dma.hbm_to_vmem [thread:$0]  (!%p1253_p12), %s174_s5, 32, %s177_s7, %s164_s1  }
  0x38   : > { %185 = sbr.rel (%p1220_p5) target bundleno = 654 (0x28e), region = 32 }
  0x3d   : > { %1090 = dma.done.wait (%p1208_p1), [#allocation8], 256  }
  0x3e   : > { %1092 = vsyncadd (%p1208_p1), [#allocation8], 4294967040  ;;  %s191_s12 = sand.u32 1, %s1103_s18  }
  0x3f   : > { %s1271_s14 = sshll.u32 %s191_s12, 1  ;;  %s192_s0 = scalar_lea.sflag [#allocation10], %s191_s12 }
  0x40   : > { %s195_s28 = scalar_lea.vmem [#allocation9], %s1271_s14 }
  0x41   : > { %1094 = dma.done.wait (%p1216_p4), %s192_s0, 32  }
  0x42   : > { %1096 = vsyncadd (%p1216_p4), %s192_s0, 4294967264  ;;  %p219_p5 = scmp.lt.s32.totalorder %s1115_s21, 1  ;;  %p224_p7 = scmp.eq.s32.totalorder %s1111_s20, 0 }
  0x43   : > { %s1280_s1 = sld [smem:[#allocation6]]  ;;  %p801_p1 = scmp.ne.s32.totalorder %s1111_s20, 0 }
  0x44   : > { %s220_s25 = scalar_select %p219_p5, %s1115_s21, 1 }
  0x45   : > { %227 = sbr.rel (%p801_p1) target bundleno = 77 (0x4d), region = 44 }
  0x46   : > { %s800_s27 = sshll.u32 %s220_s25, 2 }
  0x47   : > { %s1286_s5 = scalar_lea.vmem %s1364_s4, %s800_s27 }
  0x4a   : > { %v1133_v0 = vmov 0.0  }
  0x4b   : > { %228 = vst [vmem:[#allocation2] sm:$0x1] %v1133_v0  ;;  %229 = vst [vmem:[#allocation3] sm:$0x1] %v1133_v0 }
  0x4c   : > { %230 = vst [vmem:[#allocation4] sm:$0x1] %v1133_v0 }
  0x4d PF: > { %p231_p4 = scmp.eq.s32.totalorder %s1115_s21, 0 }
  0x4f   : > { %p232_p11 = pnand %p231_p4, %p224_p7 }
  0x51   : > { %235 = sbr.rel (%p232_p11) target bundleno = 366 (0x16e), region = 48 }
  0x56   : > { %v238_v1 = vlaneseq  ;;  %v1134_v2 = vmov 0.0   ;;  %v803_v4 = vld [vmem:[%s1363_s3 + $0x1] ss:$0 sm:$0xff]  ;;  %v802_v5 = vld [vmem:[%s1363_s3] ss:$0 sm:$0xff]  ;;  %v1135_v10 = vmov 1.0  }
  0x57   : > { %376 = vmatprep.mubr.f32.mxu0 %v1134_v2  ;;  %382 = vmatprep.mubr.f32.mxu1 %v1134_v2  ;;  %v303_v14 = vld [vmem:[#allocation7] sm:$0xff]  ;;  %v304_v15 = vld [vmem:[#allocation7 + $0x8] sm:$0xff]  ;;  %v1136_v61 = vmov 1966171168  }
  0x58   : > { %v1292_v3 = vshrl.u32 %v238_v1, 7  ;;  %v438_v62 = vunpack.c.l.s4 %v1136_v61 }
  0x5a   : > { %v246_v6 = vadd.s32 56, %v1292_v3  ;;  %v245_v7 = vadd.s32 48, %v1292_v3  ;;  %v244_v8 = vadd.s32 40, %v1292_v3  ;;  %v243_v9 = vadd.s32 32, %v1292_v3 }
  0x5b   : > { %v242_v11 = vadd.s32 24, %v1292_v3  ;;  %v241_v12 = vadd.s32 16, %v1292_v3  ;;  %v240_v13 = vadd.s32 8, %v1292_v3  ;;  %vm256_vm14 = vcmp.eq.s32.totalorder %v1292_v3, %v803_v4 }
  0x5c   : > { %vm270_vm0 = vcmp.eq.s32.totalorder %v246_v6, %v803_v4  ;;  %vm269_vm1 = vcmp.eq.s32.totalorder %v246_v6, %v802_v5  ;;  %vm268_vm2 = vcmp.eq.s32.totalorder %v245_v7, %v803_v4  ;;  %vm267_vm3 = vcmp.eq.s32.totalorder %v245_v7, %v802_v5 }
  0x5d   : > { %820 = vmatprep.subr.msk.mxu0 %vm270_vm0, %v1135_v10  ;;  %876 = vmatprep.subr.msk.mxu1 %vm270_vm0, %v1135_v10  ;;  %vm266_vm4 = vcmp.eq.s32.totalorder %v244_v8, %v803_v4  ;;  %vm265_vm5 = vcmp.eq.s32.totalorder %v244_v8, %v802_v5  ;;  %vm264_vm6 = vcmp.eq.s32.totalorder %v243_v9, %v803_v4  ;;  %vm305_vm0 = vcmask 523264  }
  0x5e   : > { %821 = vmatpush1.msk.msra.mxu0 %vm269_vm1, %v1135_v10  ;;  %884 = vmatpush1.msk.msra.mxu1 %vm269_vm1, %v1135_v10  ;;  %vm263_vm7 = vcmp.eq.s32.totalorder %v243_v9, %v802_v5  ;;  %vm262_vm8 = vcmp.eq.s32.totalorder %v242_v11, %v803_v4  ;;  %vm261_vm9 = vcmp.eq.s32.totalorder %v242_v11, %v802_v5  ;;  %v439_v1 = vunpack.c.0.s8 %v438_v62 }
  0x5f   : > { %822 = vmatprep.subr.msk.mxu0 %vm268_vm2, %v1135_v10  ;;  %877 = vmatprep.subr.msk.mxu1 %vm268_vm2, %v1135_v10  ;;  %vm260_vm10 = vcmp.eq.s32.totalorder %v241_v12, %v803_v4  ;;  %vm259_vm11 = vcmp.eq.s32.totalorder %v241_v12, %v802_v5  ;;  %vm258_vm12 = vcmp.eq.s32.totalorder %v240_v13, %v803_v4 }
  0x60   : > { %823 = vmatpush1.msk.msra.mxu0 %vm267_vm3, %v1135_v10  ;;  %885 = vmatpush1.msk.msra.mxu1 %vm267_vm3, %v1135_v10  ;;  %vm257_vm13 = vcmp.eq.s32.totalorder %v240_v13, %v802_v5  ;;  %vm255_vm15 = vcmp.eq.s32.totalorder %v1292_v3, %v802_v5  ;;  %v442_v5 = vsub.s32 %v439_v1, %v1292_v3 }
  0x61   : > { %824 = vmatprep.subr.msk.mxu0 %vm266_vm4, %v1135_v10  ;;  %878 = vmatprep.subr.msk.mxu1 %vm266_vm4, %v1135_v10 }
  0x62   : > { %825 = vmatpush1.msk.msra.mxu0 %vm265_vm5, %v1135_v10  ;;  %886 = vmatpush1.msk.msra.mxu1 %vm265_vm5, %v1135_v10 }
  0x63   : > { %826 = vmatprep.subr.msk.mxu0 %vm264_vm6, %v1135_v10  ;;  %879 = vmatprep.subr.msk.mxu1 %vm264_vm6, %v1135_v10 }
  0x64   : > { %827 = vmatpush1.msk.msra.mxu0 %vm263_vm7, %v1135_v10  ;;  %887 = vmatpush1.msk.msra.mxu1 %vm263_vm7, %v1135_v10 }
  0x65   : > { %828 = vmatprep.subr.msk.mxu0 %vm262_vm8, %v1135_v10  ;;  %880 = vmatprep.subr.msk.mxu1 %vm262_vm8, %v1135_v10 }
  0x66   : > { %829 = vmatpush1.msk.msra.mxu0 %vm261_vm9, %v1135_v10  ;;  %888 = vmatpush1.msk.msra.mxu1 %vm261_vm9, %v1135_v10 }
  0x67   : > { %830 = vmatprep.subr.msk.mxu0 %vm260_vm10, %v1135_v10  ;;  %881 = vmatprep.subr.msk.mxu1 %vm260_vm10, %v1135_v10 }
  0x68   : > { %831 = vmatpush1.msk.msra.mxu0 %vm259_vm11, %v1135_v10  ;;  %889 = vmatpush1.msk.msra.mxu1 %vm259_vm11, %v1135_v10 }
  0x69   : > { %832 = vmatprep.subr.msk.mxu0 %vm258_vm12, %v1135_v10  ;;  %882 = vmatprep.subr.msk.mxu1 %vm258_vm12, %v1135_v10 }
  0x6a   : > { %833 = vmatpush1.msk.msra.mxu0 %vm257_vm13, %v1135_v10  ;;  %890 = vmatpush1.msk.msra.mxu1 %vm257_vm13, %v1135_v10 }
  0x6b   : > { %834 = vmatprep.subr.msk.mxu0 %vm256_vm14, %v1135_v10  ;;  %883 = vmatprep.subr.msk.mxu1 %vm256_vm14, %v1135_v10 }
  0x6c   : > { %835 = vmatpush1.msk.msra.mxu0 %vm255_vm15, %v1135_v10  ;;  %891 = vmatpush1.msk.msra.mxu1 %vm255_vm15, %v1135_v10  ;;  %v434_v10 = vld [vmem:[#allocation3] sm:$0x1] }
  0x6d   : > { %836 = vmatmul.mubr.msk.f32.vlgmr.msra.gmra.mxu0 %vm305_vm0, %v303_v14  ;;  %837 = vmatmul.mubr.msk.f32.vlgmr.msra.gmra.mxu1 %vm305_vm0, %v304_v15 }
 0x12d   : > { %v378_v16 = vpop.f32.mrf.mxu0  ;;  %v384_v17 = vpop.f32.mrf.mxu1 }
 0x12e   : > { %v401_v18 = vmul.f32 %v378_v16, %v378_v16  ;;  %v402_v19 = vmul.f32 %v384_v17, %v384_v17  ;;  %v398_v38 = vmul.f32 2.0, %v384_v17 }
 0x12f   : > { %v380_v20 = vpop.f32.mrf.mxu0  ;;  %v386_v21 = vpop.f32.mrf.mxu1 }
 0x130   : > { %v403_v22 = vadd.f32 %v402_v19, %v401_v18  ;;  %v412_v23 = vmul.f32 %v380_v20, %v380_v20  ;;  %v389_v24 = vmul.f32 %v380_v20, %v378_v16  ;;  %v390_v25 = vmul.f32 %v386_v21, %v384_v17 }
 0x131   : > { %v413_v26 = vmul.f32 %v386_v21, %v386_v21  ;;  %v421_v40 = vmul.f32 2.0, %v386_v21  ;;  %v410_v44 = vmul.f32 %v398_v38, %v384_v17  ;;  %v399_v56 = vmul.f32 %v398_v38, %v386_v21 }
 0x132   : > { %v404_v27 = vrot.slane %v403_v22, 4  ;;  %v391_v30 = vadd.f32 %v390_v25, %v389_v24 }
 0x133   : > { %v414_v28 = vadd.f32 %v413_v26, %v412_v23  ;;  %v422_v46 = vmul.f32 %v421_v40, %v386_v21 }
 0x134   : > { %v405_v29 = vadd.f32 %v404_v27, %v403_v22  ;;  %v392_v35 = vrot.slane %v391_v30, 4 }
 0x135   : > { %v415_v31 = vrot.slane %v414_v28, 4 }
 0x136   : > { %v406_v32 = vrot.slane %v405_v29, 2  ;;  %v393_v42 = vadd.f32 %v392_v35, %v391_v30 }
 0x137   : > { %v416_v33 = vadd.f32 %v415_v31, %v414_v28 }
 0x138   : > { %v407_v34 = vadd.f32 %v406_v32, %v405_v29  ;;  %v394_v48 = vrot.slane %v393_v42, 2 }
 0x139   : > { %v417_v36 = vrot.slane %v416_v33, 2 }
 0x13a   : > { %v408_v37 = vrot.slane %v407_v34, 1  ;;  %v395_v51 = vadd.f32 %v394_v48, %v393_v42 }
 0x13b   : > { %v418_v39 = vadd.f32 %v417_v36, %v416_v33 }
 0x13c   : > { %v409_v41 = vadd.f32 %v408_v37, %v407_v34  ;;  %v396_v54 = vrot.slane %v395_v51, 1 }
 0x13d   : > { %v419_v43 = vrot.slane %v418_v39, 1 }
 0x13e   : > { %v411_v47 = vsub.f32 %v409_v41, %v410_v44  ;;  %v397_v55 = vadd.f32 %v396_v54, %v395_v51 }
 0x13f   : > { %v420_v45 = vadd.f32 %v419_v43, %v418_v39 }
 0x140   : > { %v400_v57 = vsub.f32 %v397_v55, %v399_v56 }
 0x141   : > { %v423_v49 = vsub.f32 %v420_v45, %v422_v46 }
 0x142   : > { %v427_v58 = vmul.f32 %v400_v57, %v400_v57 }
 0x143   : > { %v424_v50 = vmul.f32 %v423_v49, %v411_v47 }
 0x145   : > { %v425_v52 = vand.u32 2147483647, %v424_v50 }
 0x147   : > { %v426_v53 = vmax.f32 %v425_v52, 1e-09 }
 0x149   : > { %999 = vrcp.f32 %v426_v53 }
 0x156   : > { %v1000_v59 = vpop.eup %999 }
 0x157   : > { %v429_v60 = vmul.f32 %v1000_v59, %v427_v58 }
 0x159   : > { %v430_v63 = vsub.f32 1.0, %v429_v60 }
 0x15b   : > { %v431_v0 = vmin.f32 %v430_v63, 10.0 }
 0x15d   : > { %v432_v2 = vsub.f32 1.0, %v431_v0 }
 0x15f   : > { %v433_v4 = vmax.f32 %v432_v2, 0.0 }
 0x161   : > { %v436_v6 = vcombine.high %v433_v4, %v433_v4 }
 0x163   : > { %v443_v7 = vrot.slane %v436_v6, %v442_v5 }
 0x165   : > { %v444_v8 = vcombine.high %v443_v7, %v443_v7 }
 0x167   : > { %v451_v9 = vrot.slane %v444_v8, %v442_v5 }
 0x169   : > { %v452_v11 = vcombine.high %v451_v9, %v451_v9 }
 0x16b   : > { %v454_v12 = vadd.f32 %v452_v11, %v434_v10 }
 0x16d   : > { %455 = vst [vmem:[#allocation3] sm:$0x1] %v454_v12 }
 0x16e PF: > { %v457_v13 = vld [vmem:[%s195_s28 + $0x1] sm:$0x1]  ;;  %v464_v14 = vlaneseq  ;;  %v456_v15 = vld [vmem:[%s195_s28] sm:$0x1]  ;;  %v458_v16 = vstv %s1280_s1  ;;  %v1137_v3 = vmov 0.0   ;;  %v1138_v28 = vmov 1.0  }
 0x16f   : > { %vm459_vm1 = vcmp.lt.s32.totalorder %v456_v15, %v458_v16  ;;  %vm460_vm2 = vcmp.lt.s32.totalorder %v457_v13, %v458_v16  ;;  %602 = vmatprep.mubr.f32.mxu0 %v1137_v3  ;;  %608 = vmatprep.mubr.f32.mxu1 %v1137_v3  ;;  %v663_v18 = vld [vmem:[#allocation4] sm:$0x1]  ;;  %v529_v32 = vld [vmem:[#allocation7] sm:$0xff]  ;;  %v530_v33 = vld [vmem:[#allocation7 + $0x8] sm:$0xff]  ;;  %p873_p12 = scmp.ne.s32.totalorder %s1111_s20, 1 }
 0x170   : > { %v1315_v17 = vshrl.u32 %v464_v14, 7  ;;  %vm461_vm3 = vmand %vm459_vm1, %vm460_vm2  ;;  %v1139_v14 = vmov 1966171168  }
 0x171   : > { %v1320_v22 = vsel %vm461_vm3, 1.0, %v1137_v3 }
 0x172   : > { %v472_v19 = vadd.s32 56, %v1315_v17  ;;  %v475_v20 = vsub.s32 0, %v1315_v17  ;;  %v471_v21 = vadd.s32 48, %v1315_v17  ;;  %v470_v25 = vadd.s32 40, %v1315_v17 }
 0x173   : > { %v684_v26 = vadd.f32 %v1320_v22, %v663_v18  ;;  %v469_v27 = vadd.s32 32, %v1315_v17  ;;  %v468_v29 = vadd.s32 24, %v1315_v17  ;;  %v467_v30 = vadd.s32 16, %v1315_v17 }
 0x174   : > { %v480_v23 = vrot.slane %v457_v13, %v475_v20  ;;  %v476_v24 = vrot.slane %v456_v15, %v475_v20  ;;  %v466_v31 = vadd.s32 8, %v1315_v17  ;;  %v667_v15 = vunpack.c.l.s4 %v1139_v14 }
 0x175   : > { %686 = vst [vmem:[#allocation4] sm:$0x1] %v684_v26  ;;  %v659_v18 = vrot.slane %v1320_v22, 1 }
 0x176   : > { %vm496_vm4 = vcmp.eq.s32.totalorder %v472_v19, %v480_v23  ;;  %vm495_vm5 = vcmp.eq.s32.totalorder %v472_v19, %v476_v24  ;;  %vm494_vm6 = vcmp.eq.s32.totalorder %v471_v21, %v480_v23  ;;  %vm493_vm7 = vcmp.eq.s32.totalorder %v471_v21, %v476_v24 }
 0x177   : > { %855 = vmatprep.subr.msk.mxu0 %vm496_vm4, %v1138_v28  ;;  %892 = vmatprep.subr.msk.mxu1 %vm496_vm4, %v1138_v28  ;;  %vm492_vm8 = vcmp.eq.s32.totalorder %v470_v25, %v480_v23  ;;  %vm491_vm9 = vcmp.eq.s32.totalorder %v470_v25, %v476_v24  ;;  %vm490_vm10 = vcmp.eq.s32.totalorder %v469_v27, %v480_v23  ;;  %vm531_vm4 = vcmask 523264  }
 0x178   : > { %856 = vmatpush1.msk.msra.mxu0 %vm495_vm5, %v1138_v28  ;;  %900 = vmatpush1.msk.msra.mxu1 %vm495_vm5, %v1138_v28  ;;  %vm489_vm11 = vcmp.eq.s32.totalorder %v469_v27, %v476_v24  ;;  %vm488_vm12 = vcmp.eq.s32.totalorder %v468_v29, %v480_v23  ;;  %vm487_vm13 = vcmp.eq.s32.totalorder %v468_v29, %v476_v24  ;;  %v668_v20 = vunpack.c.0.s8 %v667_v15  ;;  %v662_v29 = vld [vmem:[#allocation2] sm:$0x1] }
 0x179   : > { %857 = vmatprep.subr.msk.mxu0 %vm494_vm6, %v1138_v28  ;;  %893 = vmatprep.subr.msk.mxu1 %vm494_vm6, %v1138_v28  ;;  %vm486_vm14 = vcmp.eq.s32.totalorder %v467_v30, %v480_v23  ;;  %vm485_vm15 = vcmp.eq.s32.totalorder %v467_v30, %v476_v24  ;;  %vm484_vm0 = vcmp.eq.s32.totalorder %v466_v31, %v480_v23 }
 0x17a   : > { %858 = vmatpush1.msk.msra.mxu0 %vm493_vm7, %v1138_v28  ;;  %901 = vmatpush1.msk.msra.mxu1 %vm493_vm7, %v1138_v28  ;;  %vm483_vm1 = vcmp.eq.s32.totalorder %v466_v31, %v476_v24  ;;  %vm482_vm2 = vcmp.eq.s32.totalorder %v1315_v17, %v480_v23  ;;  %vm481_vm3 = vcmp.eq.s32.totalorder %v1315_v17, %v476_v24 }
 0x17b   : > { %859 = vmatprep.subr.msk.mxu0 %vm492_vm8, %v1138_v28  ;;  %894 = vmatprep.subr.msk.mxu1 %vm492_vm8, %v1138_v28  ;;  %v671_v24 = vsub.s32 %v668_v20, %v1315_v17 }
 0x17c   : > { %860 = vmatpush1.msk.msra.mxu0 %vm491_vm9, %v1138_v28  ;;  %902 = vmatpush1.msk.msra.mxu1 %vm491_vm9, %v1138_v28 }
 0x17d   : > { %861 = vmatprep.subr.msk.mxu0 %vm490_vm10, %v1138_v28  ;;  %895 = vmatprep.subr.msk.mxu1 %vm490_vm10, %v1138_v28 }
 0x17e   : > { %862 = vmatpush1.msk.msra.mxu0 %vm489_vm11, %v1138_v28  ;;  %903 = vmatpush1.msk.msra.mxu1 %vm489_vm11, %v1138_v28 }
 0x17f   : > { %863 = vmatprep.subr.msk.mxu0 %vm488_vm12, %v1138_v28  ;;  %896 = vmatprep.subr.msk.mxu1 %vm488_vm12, %v1138_v28 }
 0x180   : > { %864 = vmatpush1.msk.msra.mxu0 %vm487_vm13, %v1138_v28  ;;  %904 = vmatpush1.msk.msra.mxu1 %vm487_vm13, %v1138_v28 }
 0x181   : > { %865 = vmatprep.subr.msk.mxu0 %vm486_vm14, %v1138_v28  ;;  %897 = vmatprep.subr.msk.mxu1 %vm486_vm14, %v1138_v28 }
 0x182   : > { %866 = vmatpush1.msk.msra.mxu0 %vm485_vm15, %v1138_v28  ;;  %905 = vmatpush1.msk.msra.mxu1 %vm485_vm15, %v1138_v28 }
 0x183   : > { %867 = vmatprep.subr.msk.mxu0 %vm484_vm0, %v1138_v28  ;;  %898 = vmatprep.subr.msk.mxu1 %vm484_vm0, %v1138_v28 }
 0x184   : > { %868 = vmatpush1.msk.msra.mxu0 %vm483_vm1, %v1138_v28  ;;  %906 = vmatpush1.msk.msra.mxu1 %vm483_vm1, %v1138_v28 }
 0x185   : > { %869 = vmatprep.subr.msk.mxu0 %vm482_vm2, %v1138_v28  ;;  %899 = vmatprep.subr.msk.mxu1 %vm482_vm2, %v1138_v28 }
 0x186   : > { %870 = vmatpush1.msk.msra.mxu0 %vm481_vm3, %v1138_v28  ;;  %907 = vmatpush1.msk.msra.mxu1 %vm481_vm3, %v1138_v28 }
 0x187   : > { %871 = vmatmul.mubr.msk.f32.vlgmr.msra.gmra.mxu0 %vm531_vm4, %v529_v32  ;;  %872 = vmatmul.mubr.msk.f32.vlgmr.msra.gmra.mxu1 %vm531_vm4, %v530_v33 }
 0x247   : > { %v604_v34 = vpop.f32.mrf.mxu0  ;;  %v610_v35 = vpop.f32.mrf.mxu1 }
 0x248   : > { %v627_v36 = vmul.f32 %v604_v34, %v604_v34  ;;  %v628_v37 = vmul.f32 %v610_v35, %v610_v35  ;;  %v624_v56 = vmul.f32 2.0, %v610_v35 }
 0x249   : > { %v606_v38 = vpop.f32.mrf.mxu0  ;;  %v612_v39 = vpop.f32.mrf.mxu1 }
 0x24a   : > { %v629_v40 = vadd.f32 %v628_v37, %v627_v36  ;;  %v638_v41 = vmul.f32 %v606_v38, %v606_v38  ;;  %v615_v42 = vmul.f32 %v606_v38, %v604_v34  ;;  %v616_v43 = vmul.f32 %v612_v39, %v610_v35 }
 0x24b   : > { %v639_v44 = vmul.f32 %v612_v39, %v612_v39  ;;  %v647_v58 = vmul.f32 2.0, %v612_v39  ;;  %v636_v62 = vmul.f32 %v624_v56, %v610_v35  ;;  %v625_v11 = vmul.f32 %v624_v56, %v612_v39 }
 0x24c   : > { %v630_v45 = vrot.slane %v629_v40, 4  ;;  %v617_v48 = vadd.f32 %v616_v43, %v615_v42 }
 0x24d   : > { %v640_v46 = vadd.f32 %v639_v44, %v638_v41  ;;  %v648_v0 = vmul.f32 %v647_v58, %v612_v39 }
 0x24e   : > { %v631_v47 = vadd.f32 %v630_v45, %v629_v40  ;;  %v618_v53 = vrot.slane %v617_v48, 4 }
 0x24f   : > { %v641_v49 = vrot.slane %v640_v46, 4 }
 0x250   : > { %v632_v50 = vrot.slane %v631_v47, 2  ;;  %v619_v60 = vadd.f32 %v618_v53, %v617_v48 }
 0x251   : > { %v642_v51 = vadd.f32 %v641_v49, %v640_v46 }
 0x252   : > { %v633_v52 = vadd.f32 %v632_v50, %v631_v47  ;;  %v620_v2 = vrot.slane %v619_v60, 2 }
 0x253   : > { %v643_v54 = vrot.slane %v642_v51, 2 }
 0x254   : > { %v634_v55 = vrot.slane %v633_v52, 1  ;;  %v621_v6 = vadd.f32 %v620_v2, %v619_v60 }
 0x255   : > { %v644_v57 = vadd.f32 %v643_v54, %v642_v51 }
 0x256   : > { %v635_v59 = vadd.f32 %v634_v55, %v633_v52  ;;  %v622_v9 = vrot.slane %v621_v6, 1 }
 0x257   : > { %v645_v61 = vrot.slane %v644_v57, 1 }
 0x258   : > { %v637_v1 = vsub.f32 %v635_v59, %v636_v62  ;;  %v623_v10 = vadd.f32 %v622_v9, %v621_v6 }
 0x259   : > { %v646_v63 = vadd.f32 %v645_v61, %v644_v57 }
 0x25a   : > { %v626_v12 = vsub.f32 %v623_v10, %v625_v11 }
 0x25b   : > { %v649_v4 = vsub.f32 %v646_v63, %v648_v0 }
 0x25c   : > { %v653_v13 = vmul.f32 %v626_v12, %v626_v12 }
 0x25d   : > { %v650_v5 = vmul.f32 %v649_v4, %v637_v1 }
 0x25f   : > { %v651_v7 = vand.u32 2147483647, %v650_v5 }
 0x261   : > { %v652_v8 = vmax.f32 %v651_v7, 1e-09 }
 0x263   : > { %1001 = vrcp.f32 %v652_v8 }
 0x270   : > { %v1002_v16 = vpop.eup %1001 }
 0x271   : > { %v655_v3 = vmul.f32 %v1002_v16, %v653_v13 }
 0x273   : > { %v656_v19 = vsub.f32 1.0, %v655_v3 }
 0x275   : > { %v657_v21 = vmin.f32 %v656_v19, 10.0 }
 0x277   : > { %v661_v23 = vmul.f32 %v659_v18, %v657_v21 }
 0x279   : > { %v665_v25 = vcombine.high %v661_v23, %v661_v23 }
 0x27b   : > { %v672_v26 = vrot.slane %v665_v25, %v671_v24 }
 0x27d   : > { %v673_v27 = vcombine.high %v672_v26, %v672_v26 }
 0x27f   : > { %v680_v28 = vrot.slane %v673_v27, %v671_v24 }
 0x281   : > { %v681_v30 = vcombine.high %v680_v28, %v680_v28  ;;  %690 = sbr.rel (%p873_p12) target bundleno = 654 (0x28e), region = 52 }
 0x283   : > { %v683_v31 = vadd.f32 %v681_v30, %v662_v29 }
 0x285   : > { %685 = vst [vmem:[#allocation2] sm:$0x1] %v683_v31 }
 0x286   : > { %v693_v22 = vld [vmem:[#allocation3] sm:$0x1]  ;;  %v695_v33 = vld [vmem:[#allocation4] sm:$0x1] }
 0x287   : > { %694 = vst [vmem:[%s1286_s5 + $0x1] sm:$0x1] %v693_v22  ;;  %696 = vst [vmem:[%s1286_s5 + $0x2] sm:$0x1] %v695_v33 }
 0x28c   : > { %v691_v32 = vld [vmem:[#allocation2] sm:$0x1] }
 0x28d   : > { %692 = vst [vmem:[%s1286_s5] sm:$0x1] %v691_v32 }
 0x28e PF: > { %s19_s24 = sadd.s32 1, %s1127_s24   ;;  %s1371_s17 = smov %s1103_s18 }
 0x28f   : > { %p16_p13 = scmp.ge.s32.totalorder %s19_s24, 6   ;;  %s1372_s18 = smov %s1107_s19 }
 0x290   : > { %s1373_s19 = smov %s1258_s11  ;;  %s1374_s20 = smov %s1119_s22 }
 0x291   : > { %s1375_s21 = smov %s1123_s23  ;;  %s1376_s22 = smov %s1379_s9 }
 0x292   : > { %s1377_s23 = smov %s1383_s10  ;;  %18 = sbr.rel (!%p16_p13) target bundleno = 9 (0x9), region = 89 }
 0x297   :  { %716 = vsyncpa [#allocation8], 1 }
 0x298   :  { %718 = vsyncpa [#allocation8 + $0x1], 1 }
 0x299   :  { %719 = vsyncpa [#allocation10], 1 }
 0x29a   :  { %721 = vsyncpa [#allocation10 + $0x1], 1 }

</bundles_post_ra>
